<compile_context>
chip_gen: v5e
topology: v5e:2x2
jax: 0.10.0
libtpu: 0.0.40
codegen_flags: <defaults>
</compile_context>

<pallas_src>
import jax
import jax.numpy as jnp
import numpy as np
from jax import lax
from jax.experimental import pallas as pl
from jax.experimental.pallas import tpu as pltpu

_EPS = 1e-5
_VMEM_LIMIT = 48 * 1024 * 1024  # fits v7x (64 MiB physical), > default 32 MiB scoped limit


# ---------------------------------------------------------------------------
# Kernel 1: 3x3 conv, stride 1, pad 1 (input pre-padded), NHWC, no bias.
# ---------------------------------------------------------------------------
def _make_conv3x3_kernel(H, W, Cin, Cout):
    def kernel(x_ref, w_ref, o_ref):
        # x_ref: (1, H+2, W+2, Cin)   w_ref: (9, Cin, Cout)   o_ref: (1, H*W, Cout)
        acc = jnp.zeros((H * W, Cout), jnp.float32)
        for ki in range(3):
            for kj in range(3):
                patch = x_ref[0, ki:ki + H, kj:kj + W, :].reshape(H * W, Cin)
                acc = acc + jnp.dot(patch, w_ref[ki * 3 + kj],
                                    preferred_element_type=jnp.float32)
        o_ref[0] = acc

    return kernel


def conv3x3_nhwc(x_nhwc, w_oihw):
    """x_nhwc: (N,H,W,Cin) f32; w_oihw: (Cout,Cin,3,3) PyTorch layout.  Returns (N, H*W, Cout)."""
    N, H, W, Cin = x_nhwc.shape
    Cout = w_oihw.shape[0]
    x_pad = jnp.pad(x_nhwc, ((0, 0), (1, 1), (1, 1), (0, 0)))
    # w_taps[ki*3 + kj] is the (Cin, Cout) matrix for kernel tap (ki, kj)
    w_taps = jnp.transpose(w_oihw, (2, 3, 1, 0)).reshape(9, Cin, Cout).astype(jnp.float32)

    return pl.pallas_call(
        _make_conv3x3_kernel(H, W, Cin, Cout),
        out_shape=jax.ShapeDtypeStruct((N, H * W, Cout), jnp.float32),
        grid_spec=pltpu.PrefetchScalarGridSpec(
            num_scalar_prefetch=0,
            grid=(N,),
            in_specs=[
                pl.BlockSpec((1, H + 2, W + 2, Cin), lambda n: (n, 0, 0, 0)),
                pl.BlockSpec((9, Cin, Cout), lambda n: (0, 0, 0)),  # resident weights
            ],
            out_specs=pl.BlockSpec((1, H * W, Cout), lambda n: (n, 0, 0)),
        ),
        compiler_params=pltpu.CompilerParams(
            dimension_semantics=("parallel",),  # batch shards across v7x TensorCores
            vmem_limit_bytes=_VMEM_LIMIT,
        ),
    )(x_pad, w_taps)


# ---------------------------------------------------------------------------
# Kernel 2: BN stats pass -- per-channel sum / sum-of-squares (tiled over rows).
# ---------------------------------------------------------------------------
def _bn_stats_kernel(y_ref, s_ref, ss_ref):
    @pl.when(pl.program_id(0) == 0)
    def _():
        s_ref[...] = jnp.zeros_like(s_ref)
        ss_ref[...] = jnp.zeros_like(ss_ref)

    y = y_ref[...]
    s_ref[...] += jnp.sum(y, axis=0, keepdims=True)
    ss_ref[...] += jnp.sum(y * y, axis=0, keepdims=True)


# ---------------------------------------------------------------------------
# Kernel 3: BN apply (scale/shift from stats) + ReLU (tiled over rows).
# ---------------------------------------------------------------------------
def _make_bn_apply_relu_kernel(inv_count, eps):
    def kernel(y_ref, s_ref, ss_ref, g_ref, b_ref, o_ref):
        mean = s_ref[...] * inv_count
        var = ss_ref[...] * inv_count - mean * mean  # biased var, PyTorch train-mode BN
        inv = lax.rsqrt(var + eps)
        scale = g_ref[...] * inv
        shift = b_ref[...] - mean * scale
        o_ref[...] = jnp.maximum(y_ref[...] * scale + shift, 0.0)

    return kernel


def bn_relu_rows(y2d, gamma, beta, *, eps=_EPS, tm_target=2048):
    """Train-mode BatchNorm (batch stats, biased var) + ReLU over rows of a (M, C) slab."""
    M, C = y2d.shape
    tm = min(tm_target, ((M + 7) // 8) * 8)       # multiple of 8 sublanes
    n_tiles = pl.cdiv(M, tm)
    M_pad = n_tiles * tm
    # Zero-pad rows instead of shrinking the tile; zero rows add nothing to sum/sumsq
    # and the true row count M is used for the mean/var below.
    y_pad = jnp.pad(y2d, ((0, M_pad - M), (0, 0))) if M_pad != M else y2d

    s, ss = pl.pallas_call(
        _bn_stats_kernel,
        out_shape=(jax.ShapeDtypeStruct((1, C), jnp.float32),
                   jax.ShapeDtypeStruct((1, C), jnp.float32)),
        grid_spec=pltpu.PrefetchScalarGridSpec(
            num_scalar_prefetch=0,
            grid=(n_tiles,),
            in_specs=[pl.BlockSpec((tm, C), lambda i: (i, 0))],
            out_specs=(pl.BlockSpec((1, C), lambda i: (0, 0)),
                       pl.BlockSpec((1, C), lambda i: (0, 0))),
        ),
        compiler_params=pltpu.CompilerParams(
            dimension_semantics=("arbitrary",),   # resident accumulator outputs
            vmem_limit_bytes=_VMEM_LIMIT,
        ),
    )(y_pad)

    g_row = gamma.reshape(1, C).astype(jnp.float32)
    b_row = beta.reshape(1, C).astype(jnp.float32)

    out_pad = pl.pallas_call(
        _make_bn_apply_relu_kernel(1.0 / float(M), eps),
        out_shape=jax.ShapeDtypeStruct((M_pad, C), jnp.float32),
        grid_spec=pltpu.PrefetchScalarGridSpec(
            num_scalar_prefetch=0,
            grid=(n_tiles,),
            in_specs=[pl.BlockSpec((tm, C), lambda i: (i, 0)),
                      pl.BlockSpec((1, C), lambda i: (0, 0)),
                      pl.BlockSpec((1, C), lambda i: (0, 0)),
                      pl.BlockSpec((1, C), lambda i: (0, 0)),
                      pl.BlockSpec((1, C), lambda i: (0, 0))],
            out_specs=pl.BlockSpec((tm, C), lambda i: (i, 0)),
        ),
        compiler_params=pltpu.CompilerParams(
            dimension_semantics=("parallel",),    # row tiles shard across v7x TensorCores
            vmem_limit_bytes=_VMEM_LIMIT,
        ),
    )(y_pad, s, ss, g_row, b_row)

    return out_pad if M_pad == M else out_pad[:M]


# ---------------------------------------------------------------------------
# Full module forward:  conv1 -> bn1 -> relu -> conv2 -> bn2 -> relu
# ---------------------------------------------------------------------------
def double_conv2d_bn_forward(x_nchw, w1, b1, g1, beta1, w2, b2, g2, beta2):
    # b1 / b2 intentionally unused: a constant per-channel conv bias cancels exactly under
    # train-mode BatchNorm (it subtracts the per-channel batch mean).  Reference keeps them.
    del b1, b2
    N, _, H, W = x_nchw.shape
    C1, C2 = w1.shape[0], w2.shape[0]
    M = N * H * W

    x_nhwc = jnp.transpose(x_nchw, (0, 2, 3, 1)).astype(jnp.float32)  # single input transpose

    y1 = conv3x3_nhwc(x_nhwc, w1)                           # (N, H*W, C1)
    y1 = bn_relu_rows(y1.reshape(M, C1), g1, beta1)         # (M, C1)

    y2 = conv3x3_nhwc(y1.reshape(N, H, W, C1), w2)          # (N, H*W, C2)
    y2 = bn_relu_rows(y2.reshape(M, C2), g2, beta2)         # (M, C2)

    return jnp.transpose(y2.reshape(N, H, W, C2), (0, 3, 1, 2))  # single output transpose


# ---------------------------------------------------------------------------
# Pure-JAX reference (WITH conv bias, train-mode BN) for correctness checking.
# ---------------------------------------------------------------------------
def reference_forward(x, w1, b1, g1, beta1, w2, b2, g2, beta2, eps=_EPS):
    def block(x, w, b, g, be):
        y = lax.conv_general_dilated(x, w, window_strides=(1, 1),
                                     padding=((1, 1), (1, 1)),
                                     dimension_numbers=("NCHW", "OIHW", "NCHW"))
        y = y + b[None, :, None, None]
        mean = jnp.mean(y, axis=(0, 2, 3), keepdims=True)
        var = jnp.mean((y - mean) ** 2, axis=(0, 2, 3), keepdims=True)
        yn = (y - mean) * lax.rsqrt(var + eps) * g[None, :, None, None] + be[None, :, None, None]
        return jnp.maximum(yn, 0.0)

    return block(block(x, w1, b1, g1, beta1), w2, b2, g2, beta2)


if __name__ == "__main__":
    key = jax.random.PRNGKey(0)
    ks = jax.random.split(key, 9)

    N, Cin, H, W = 2, 4, 16, 16
    Cout = 4

    x = jax.random.normal(ks[0], (N, Cin, H, W), dtype=jnp.float32)
    # PyTorch Conv2d weight layout: (out_channels, in_channels, kH, kW)
    w1 = 0.2 * jax.random.normal(ks[1], (Cout, Cin, 3, 3), dtype=jnp.float32)
    b1 = 0.1 * jax.random.normal(ks[2], (Cout,), dtype=jnp.float32)
    g1 = 1.0 + 0.05 * jax.random.normal(ks[3], (Cout,), dtype=jnp.float32)
    be1 = 0.05 * jax.random.normal(ks[4], (Cout,), dtype=jnp.float32)
    w2 = 0.2 * jax.random.normal(ks[5], (Cout, Cout, 3, 3), dtype=jnp.float32)
    b2 = 0.1 * jax.random.normal(ks[6], (Cout,), dtype=jnp.float32)
    g2 = 1.0 + 0.05 * jax.random.normal(ks[7], (Cout,), dtype=jnp.float32)
    be2 = 0.05 * jax.random.normal(ks[8], (Cout,), dtype=jnp.float32)

    out = jax.block_until_ready(
        double_conv2d_bn_forward(x, w1, b1, g1, be1, w2, b2, g2, be2))
    ref = jax.block_until_ready(
        reference_forward(x, w1, b1, g1, be1, w2, b2, g2, be2))

    assert out.shape == (N, Cout, H, W), out.shape
    np.testing.assert_allclose(np.asarray(out), np.asarray(ref), rtol=2e-4, atol=2e-4)

    print("KERNEL_OK")
</pallas_src>

<mosaic_0001>
module attributes {stable_mosaic.version = 11 : i64} {
  func.func @kernel(%arg0: i32, %arg1: memref<1x18x18x4xf32, #tpu.memory_space<vmem>>, %arg2: memref<9x4x4xf32, #tpu.memory_space<vmem>>, %arg3: memref<1x256x4xf32, #tpu.memory_space<vmem>>) attributes {dimension_semantics = [#tpu.dimension_semantics<parallel>], iteration_bounds = array<i64: 2>, scalar_prefetch = 0 : i64, scratch_operands = 0 : i64, tpu.core_type = #tpu.core_type<tc>, window_params = [{transform_indices = @transform_0, window_bounds = array<i64: 1, 18, 18, 4>}, {pipeline_mode = #tpu.pipeline_mode<synchronous>, transform_indices = @transform_1, window_bounds = array<i64: 9, 4, 4>}, {transform_indices = @transform_2, window_bounds = array<i64: 1, 256, 4>}]} {
    %cst = arith.constant 0.000000e+00 : f32
    %0 = vector.broadcast %cst : f32 to vector<256x4xf32>
    %c0 = arith.constant 0 : index
    %c0_0 = arith.constant 0 : index
    %c0_1 = arith.constant 0 : index
    %c0_2 = arith.constant 0 : index
    %1 = vector.load %arg1[%c0, %c0_0, %c0_1, %c0_2] : memref<1x18x18x4xf32, #tpu.memory_space<vmem>>, vector<1x16x16x4xf32>
    %2 = vector.shape_cast %1 : vector<1x16x16x4xf32> to vector<16x16x4xf32>
    %3 = vector.shape_cast %2 : vector<16x16x4xf32> to vector<256x4xf32>
    %c0_3 = arith.constant 0 : index
    %c0_4 = arith.constant 0 : index
    %c0_5 = arith.constant 0 : index
    %4 = vector.load %arg2[%c0_3, %c0_4, %c0_5] : memref<9x4x4xf32, #tpu.memory_space<vmem>>, vector<1x4x4xf32>
    %5 = vector.shape_cast %4 : vector<1x4x4xf32> to vector<4x4xf32>
    %cst_6 = arith.constant dense<0.000000e+00> : vector<256x4xf32>
    %6 = tpu.matmul %3, %5, %cst_6 {dimension_numbers = #tpu.dot_dimension_numbers<[1], [0], [0], [1], [0, 0, 1, 1], [], []>} : vector<256x4xf32>, vector<4x4xf32>, vector<256x4xf32> -> vector<256x4xf32>
    %7 = arith.addf %0, %6 : vector<256x4xf32>
    %c0_7 = arith.constant 0 : index
    %c0_8 = arith.constant 0 : index
    %c1 = arith.constant 1 : index
    %c0_9 = arith.constant 0 : index
    %8 = vector.load %arg1[%c0_7, %c0_8, %c1, %c0_9] : memref<1x18x18x4xf32, #tpu.memory_space<vmem>>, vector<1x16x16x4xf32>
    %9 = vector.shape_cast %8 : vector<1x16x16x4xf32> to vector<16x16x4xf32>
    %10 = vector.shape_cast %9 : vector<16x16x4xf32> to vector<256x4xf32>
    %c1_10 = arith.constant 1 : index
    %c0_11 = arith.constant 0 : index
    %c0_12 = arith.constant 0 : index
    %11 = vector.load %arg2[%c1_10, %c0_11, %c0_12] : memref<9x4x4xf32, #tpu.memory_space<vmem>>, vector<1x4x4xf32>
    %12 = vector.shape_cast %11 : vector<1x4x4xf32> to vector<4x4xf32>
    %cst_13 = arith.constant dense<0.000000e+00> : vector<256x4xf32>
    %13 = tpu.matmul %10, %12, %cst_13 {dimension_numbers = #tpu.dot_dimension_numbers<[1], [0], [0], [1], [0, 0, 1, 1], [], []>} : vector<256x4xf32>, vector<4x4xf32>, vector<256x4xf32> -> vector<256x4xf32>
    %14 = arith.addf %7, %13 : vector<256x4xf32>
    %c0_14 = arith.constant 0 : index
    %c0_15 = arith.constant 0 : index
    %c2 = arith.constant 2 : index
    %c0_16 = arith.constant 0 : index
    %15 = vector.load %arg1[%c0_14, %c0_15, %c2, %c0_16] : memref<1x18x18x4xf32, #tpu.memory_space<vmem>>, vector<1x16x16x4xf32>
    %16 = vector.shape_cast %15 : vector<1x16x16x4xf32> to vector<16x16x4xf32>
    %17 = vector.shape_cast %16 : vector<16x16x4xf32> to vector<256x4xf32>
    %c2_17 = arith.constant 2 : index
    %c0_18 = arith.constant 0 : index
    %c0_19 = arith.constant 0 : index
    %18 = vector.load %arg2[%c2_17, %c0_18, %c0_19] : memref<9x4x4xf32, #tpu.memory_space<vmem>>, vector<1x4x4xf32>
    %19 = vector.shape_cast %18 : vector<1x4x4xf32> to vector<4x4xf32>
    %cst_20 = arith.constant dense<0.000000e+00> : vector<256x4xf32>
    %20 = tpu.matmul %17, %19, %cst_20 {dimension_numbers = #tpu.dot_dimension_numbers<[1], [0], [0], [1], [0, 0, 1, 1], [], []>} : vector<256x4xf32>, vector<4x4xf32>, vector<256x4xf32> -> vector<256x4xf32>
    %21 = arith.addf %14, %20 : vector<256x4xf32>
    %c0_21 = arith.constant 0 : index
    %c1_22 = arith.constant 1 : index
    %c0_23 = arith.constant 0 : index
    %c0_24 = arith.constant 0 : index
    %22 = vector.load %arg1[%c0_21, %c1_22, %c0_23, %c0_24] : memref<1x18x18x4xf32, #tpu.memory_space<vmem>>, vector<1x16x16x4xf32>
    %23 = vector.shape_cast %22 : vector<1x16x16x4xf32> to vector<16x16x4xf32>
    %24 = vector.shape_cast %23 : vector<16x16x4xf32> to vector<256x4xf32>
    %c3 = arith.constant 3 : index
    %c0_25 = arith.constant 0 : index
    %c0_26 = arith.constant 0 : index
    %25 = vector.load %arg2[%c3, %c0_25, %c0_26] : memref<9x4x4xf32, #tpu.memory_space<vmem>>, vector<1x4x4xf32>
    %26 = vector.shape_cast %25 : vector<1x4x4xf32> to vector<4x4xf32>
    %cst_27 = arith.constant dense<0.000000e+00> : vector<256x4xf32>
    %27 = tpu.matmul %24, %26, %cst_27 {dimension_numbers = #tpu.dot_dimension_numbers<[1], [0], [0], [1], [0, 0, 1, 1], [], []>} : vector<256x4xf32>, vector<4x4xf32>, vector<256x4xf32> -> vector<256x4xf32>
    %28 = arith.addf %21, %27 : vector<256x4xf32>
    %c0_28 = arith.constant 0 : index
    %c1_29 = arith.constant 1 : index
    %c1_30 = arith.constant 1 : index
    %c0_31 = arith.constant 0 : index
    %29 = vector.load %arg1[%c0_28, %c1_29, %c1_30, %c0_31] : memref<1x18x18x4xf32, #tpu.memory_space<vmem>>, vector<1x16x16x4xf32>
    %30 = vector.shape_cast %29 : vector<1x16x16x4xf32> to vector<16x16x4xf32>
    %31 = vector.shape_cast %30 : vector<16x16x4xf32> to vector<256x4xf32>
    %c4 = arith.constant 4 : index
    %c0_32 = arith.constant 0 : index
    %c0_33 = arith.constant 0 : index
    %32 = vector.load %arg2[%c4, %c0_32, %c0_33] : memref<9x4x4xf32, #tpu.memory_space<vmem>>, vector<1x4x4xf32>
    %33 = vector.shape_cast %32 : vector<1x4x4xf32> to vector<4x4xf32>
    %cst_34 = arith.constant dense<0.000000e+00> : vector<256x4xf32>
    %34 = tpu.matmul %31, %33, %cst_34 {dimension_numbers = #tpu.dot_dimension_numbers<[1], [0], [0], [1], [0, 0, 1, 1], [], []>} : vector<256x4xf32>, vector<4x4xf32>, vector<256x4xf32> -> vector<256x4xf32>
    %35 = arith.addf %28, %34 : vector<256x4xf32>
    %c0_35 = arith.constant 0 : index
    %c1_36 = arith.constant 1 : index
    %c2_37 = arith.constant 2 : index
    %c0_38 = arith.constant 0 : index
    %36 = vector.load %arg1[%c0_35, %c1_36, %c2_37, %c0_38] : memref<1x18x18x4xf32, #tpu.memory_space<vmem>>, vector<1x16x16x4xf32>
    %37 = vector.shape_cast %36 : vector<1x16x16x4xf32> to vector<16x16x4xf32>
    %38 = vector.shape_cast %37 : vector<16x16x4xf32> to vector<256x4xf32>
    %c5 = arith.constant 5 : index
    %c0_39 = arith.constant 0 : index
    %c0_40 = arith.constant 0 : index
    %39 = vector.load %arg2[%c5, %c0_39, %c0_40] : memref<9x4x4xf32, #tpu.memory_space<vmem>>, vector<1x4x4xf32>
    %40 = vector.shape_cast %39 : vector<1x4x4xf32> to vector<4x4xf32>
    %cst_41 = arith.constant dense<0.000000e+00> : vector<256x4xf32>
    %41 = tpu.matmul %38, %40, %cst_41 {dimension_numbers = #tpu.dot_dimension_numbers<[1], [0], [0], [1], [0, 0, 1, 1], [], []>} : vector<256x4xf32>, vector<4x4xf32>, vector<256x4xf32> -> vector<256x4xf32>
    %42 = arith.addf %35, %41 : vector<256x4xf32>
    %c0_42 = arith.constant 0 : index
    %c2_43 = arith.constant 2 : index
    %c0_44 = arith.constant 0 : index
    %c0_45 = arith.constant 0 : index
    %43 = vector.load %arg1[%c0_42, %c2_43, %c0_44, %c0_45] : memref<1x18x18x4xf32, #tpu.memory_space<vmem>>, vector<1x16x16x4xf32>
    %44 = vector.shape_cast %43 : vector<1x16x16x4xf32> to vector<16x16x4xf32>
    %45 = vector.shape_cast %44 : vector<16x16x4xf32> to vector<256x4xf32>
    %c6 = arith.constant 6 : index
    %c0_46 = arith.constant 0 : index
    %c0_47 = arith.constant 0 : index
    %46 = vector.load %arg2[%c6, %c0_46, %c0_47] : memref<9x4x4xf32, #tpu.memory_space<vmem>>, vector<1x4x4xf32>
    %47 = vector.shape_cast %46 : vector<1x4x4xf32> to vector<4x4xf32>
    %cst_48 = arith.constant dense<0.000000e+00> : vector<256x4xf32>
    %48 = tpu.matmul %45, %47, %cst_48 {dimension_numbers = #tpu.dot_dimension_numbers<[1], [0], [0], [1], [0, 0, 1, 1], [], []>} : vector<256x4xf32>, vector<4x4xf32>, vector<256x4xf32> -> vector<256x4xf32>
    %49 = arith.addf %42, %48 : vector<256x4xf32>
    %c0_49 = arith.constant 0 : index
    %c2_50 = arith.constant 2 : index
    %c1_51 = arith.constant 1 : index
    %c0_52 = arith.constant 0 : index
    %50 = vector.load %arg1[%c0_49, %c2_50, %c1_51, %c0_52] : memref<1x18x18x4xf32, #tpu.memory_space<vmem>>, vector<1x16x16x4xf32>
    %51 = vector.shape_cast %50 : vector<1x16x16x4xf32> to vector<16x16x4xf32>
    %52 = vector.shape_cast %51 : vector<16x16x4xf32> to vector<256x4xf32>
    %c7 = arith.constant 7 : index
    %c0_53 = arith.constant 0 : index
    %c0_54 = arith.constant 0 : index
    %53 = vector.load %arg2[%c7, %c0_53, %c0_54] : memref<9x4x4xf32, #tpu.memory_space<vmem>>, vector<1x4x4xf32>
    %54 = vector.shape_cast %53 : vector<1x4x4xf32> to vector<4x4xf32>
    %cst_55 = arith.constant dense<0.000000e+00> : vector<256x4xf32>
    %55 = tpu.matmul %52, %54, %cst_55 {dimension_numbers = #tpu.dot_dimension_numbers<[1], [0], [0], [1], [0, 0, 1, 1], [], []>} : vector<256x4xf32>, vector<4x4xf32>, vector<256x4xf32> -> vector<256x4xf32>
    %56 = arith.addf %49, %55 : vector<256x4xf32>
    %c0_56 = arith.constant 0 : index
    %c2_57 = arith.constant 2 : index
    %c2_58 = arith.constant 2 : index
    %c0_59 = arith.constant 0 : index
    %57 = vector.load %arg1[%c0_56, %c2_57, %c2_58, %c0_59] : memref<1x18x18x4xf32, #tpu.memory_space<vmem>>, vector<1x16x16x4xf32>
    %58 = vector.shape_cast %57 : vector<1x16x16x4xf32> to vector<16x16x4xf32>
    %59 = vector.shape_cast %58 : vector<16x16x4xf32> to vector<256x4xf32>
    %c8 = arith.constant 8 : index
    %c0_60 = arith.constant 0 : index
    %c0_61 = arith.constant 0 : index
    %60 = vector.load %arg2[%c8, %c0_60, %c0_61] : memref<9x4x4xf32, #tpu.memory_space<vmem>>, vector<1x4x4xf32>
    %61 = vector.shape_cast %60 : vector<1x4x4xf32> to vector<4x4xf32>
    %cst_62 = arith.constant dense<0.000000e+00> : vector<256x4xf32>
    %62 = tpu.matmul %59, %61, %cst_62 {dimension_numbers = #tpu.dot_dimension_numbers<[1], [0], [0], [1], [0, 0, 1, 1], [], []>} : vector<256x4xf32>, vector<4x4xf32>, vector<256x4xf32> -> vector<256x4xf32>
    %63 = arith.addf %56, %62 : vector<256x4xf32>
    %c0_63 = arith.constant 0 : index
    %c0_64 = arith.constant 0 : index
    %c0_65 = arith.constant 0 : index
    %64 = vector.load %arg3[%c0_63, %c0_64, %c0_65] : memref<1x256x4xf32, #tpu.memory_space<vmem>>, vector<1x256x4xf32>
    %65 = vector.shape_cast %64 : vector<1x256x4xf32> to vector<256x4xf32>
    %66 = vector.shape_cast %63 : vector<256x4xf32> to vector<1x256x4xf32>
    tpu.vector_store %arg3[%c0_63, %c0_64, %c0_65], %66 {strides = array<i32>} : memref<1x256x4xf32, #tpu.memory_space<vmem>>, vector<1x256x4xf32>,
    return
  }
  func.func @transform_0(%arg0: i32) -> (i32, i32, i32, i32) {
    %c0_i32 = arith.constant 0 : i32
    %c0_i32_0 = arith.constant 0 : i32
    %c0_i32_1 = arith.constant 0 : i32
    %c0_i32_2 = arith.constant 0 : i32
    return %arg0, %c0_i32, %c0_i32_0, %c0_i32_1 : i32, i32, i32, i32
  }
  func.func @transform_1(%arg0: i32) -> (i32, i32, i32) {
    %c0_i32 = arith.constant 0 : i32
    %c0_i32_0 = arith.constant 0 : i32
    %c0_i32_1 = arith.constant 0 : i32
    %c0_i32_2 = arith.constant 0 : i32
    return %c0_i32, %c0_i32_0, %c0_i32_1 : i32, i32, i32
  }
  func.func @transform_2(%arg0: i32) -> (i32, i32, i32) {
    %c0_i32 = arith.constant 0 : i32
    %c0_i32_0 = arith.constant 0 : i32
    %c0_i32_1 = arith.constant 0 : i32
    return %arg0, %c0_i32, %c0_i32_0 : i32, i32, i32
  }
}

</mosaic_0001>

<bundles_post_ra>
// kernel: tpu_custom_call.1
= control target key start
LH: loop header
LB: loop body
LE: loop exit
PB: predicated region body
PF: predicated region fallthrough
CT: control target
= control target key end

     0   :  { %s3215_s9 = smov 0   ;;  %s4375_s0 = inlined_call_operand.vmem [shape: f32[2,18,18,4], index: 0, kind: input, shape index: {}]   ;;  %s4376_s1 = inlined_call_operand.vmem [shape: f32[9,4,4], index: 1, kind: input, shape index: {}]   ;;  %s4377_s2 = inlined_call_operand.vmem [shape: f32[2,256,4], index: 2, kind: output, shape index: {}]  }
   0x1 LB: > { %s2672_s10 = sadd.s32 4294967295, %s3198_s9   ;;  %p2676_p0 = scmp.ge.s32.totalorder %s3198_s9, 1  ;;  %s3198_s9 = sphi %s3215_s9, %s12_s9  }
   0x2   : > { %p112_p1 = scmp.lt.s32.totalorder %s3198_s9, 3 }
   0x4   : > { %p113_p2 = pnand %p2676_p0, %p112_p1 }
   0x6   : > { %116 = sbr.rel (%p113_p2) target bundleno = 726 (0x2d6), region = 28 }
   0xb   : > { %v2680_v0 = vld [vmem:[%s4376_s1 + $0x4] sm:$0xf]  ;;  %vm308_vm0 = vcmask 1043456   ;;  %p134_p3 = scmp.lt.s32.totalorder %s2672_s10, 1  ;;  %v2747_v1 = vld [vmem:[%s4376_s1 + $0x8] sm:$0xf] }
   0xc   : > { %3180 = vmatpush.msk.msra.mxu1 %vm308_vm0, %v2680_v0  ;;  %3181 = vmatpush.msk.msra.mxu2 %vm308_vm0, %v2680_v0  ;;  %v2813_v2 = vld [vmem:[%s4376_s1 + $0xc] sm:$0xf]  ;;  %v176_v3 = vld [vmem:[%s4376_s1] sm:$0xf]  ;;  %v2879_v4 = vld [vmem:[%s4376_s1 + $0x10] sm:$0xf] }
   0xd   : > { %s4495_s10 = smov (!%p134_p3, %s2672_s10), 1  ;;  %3182 = vmatpush.msk.msra.mxu3 %vm308_vm0, %v2680_v0  ;;  %2681 = vmatpush.msk.msra.mxu0 %vm308_vm0, %v2680_v0  ;;  %vm211_vm1 = vcmask 31744   ;;  %v3011_v25 = vld [vmem:[%s4376_s1 + $0x18] sm:$0xf]  ;;  %v3077_v26 = vld [vmem:[%s4376_s1 + $0x1c] sm:$0xf] }
   0xe   : > { %2748 = vmatpush.msk.msrb.mxu2 %vm308_vm0, %v2747_v1  ;;  %2714 = vmatpush.msk.msrb.mxu1 %vm308_vm0, %v176_v3  ;;  %s3183_s21 = smul.u32 432, %s4495_s10  ;;  %v2945_v27 = vld [vmem:[%s4376_s1 + $0x14] sm:$0xf]  ;;  %v3143_v32 = vld [vmem:[%s4376_s1 + $0x20] sm:$0xf]  ;;  %s3179_s5 = sshll.u32 %s4495_s10, 8 }
   0xf   : > { %2814 = vmatpush.msk.msrb.mxu3 %vm308_vm0, %v2813_v2  ;;  %2880 = vmatpush.msk.msrb.mxu0 %vm308_vm0, %v2879_v4  ;;  %s4158_s8 = scalar_lea.vmem %s4377_s2, %s3179_s5 }
  0x10   : > { %s3252_s24 = scalar_lea.vmem %s4375_s0, %s3183_s21 }
  0x11   : > { %v3255_v5 = vld [vmem:[%s3252_s24 + $0x61] sm:$0xff]  ;;  %v3272_v9 = vld [vmem:[%s3252_s24 + $0x69] sm:$0xff]  ;;  %v3289_v13 = vld [vmem:[%s3252_s24 + $0x79] sm:$0xff] }
  0x12   : > { %v3258_v6 = vld [vmem:[%s3252_s24 + $0xc1] sm:$0xff]  ;;  %2690 = vmatmul.msk.f32.vlgmr.msra.gmra.mxu1 %vm211_vm1, %v3255_v5  ;;  %v3275_v10 = vld [vmem:[%s3252_s24 + $0xc9] sm:$0xff]  ;;  %v3292_v14 = vld [vmem:[%s3252_s24 + $0xd9] sm:$0xff] }
  0x13   : > { %v3261_v7 = vld [vmem:[%s3252_s24 + $0x121] sm:$0xff]  ;;  %2698 = vmatmul.msk.f32.vlgmr.msra.gmra.mxu2 %vm211_vm1, %v3258_v6  ;;  %v3278_v11 = vld [vmem:[%s3252_s24 + $0x129] sm:$0xff]  ;;  %v3295_v15 = vld [vmem:[%s3252_s24 + $0x139] sm:$0xff]  ;;  %2946 = vmatpush.msk.msra.mxu1 %vm308_vm0, %v2945_v27 }
  0x14   : > { %v177_v8 = vld [vmem:[%s3252_s24 + $0x1] sm:$0xff]  ;;  %2706 = vmatmul.msk.f32.vlgmr.msra.gmra.mxu3 %vm211_vm1, %v3261_v7  ;;  %v178_v12 = vld [vmem:[%s3252_s24 + $0x9] sm:$0xff]  ;;  %v179_v16 = vld [vmem:[%s3252_s24 + $0x19] sm:$0xff]  ;;  %3012 = vmatpush.msk.msra.mxu2 %vm308_vm0, %v3011_v25 }
  0x15   : > { %2682 = vmatmul.msk.f32.vlgmr.msra.gmra.mxu0 %vm211_vm1, %v177_v8  ;;  %v3306_v17 = vld [vmem:[%s3252_s24 + $0x81] sm:$0xff]  ;;  %v3323_v21 = vld [vmem:[%s3252_s24 + $0x91] sm:$0xff]  ;;  %3078 = vmatpush.msk.msra.mxu3 %vm308_vm0, %v3077_v26  ;;  %v3355_v28 = vld [vmem:[%s3252_s24 + $0x99] sm:$0xff] }
  0x16   : > { %v3309_v18 = vld [vmem:[%s3252_s24 + $0xe1] sm:$0xff]  ;;  %v3326_v22 = vld [vmem:[%s3252_s24 + $0xf1] sm:$0xff]  ;;  %v3358_v29 = vld [vmem:[%s3252_s24 + $0xf9] sm:$0xff]  ;;  %3144 = vmatpush.msk.msra.mxu0 %vm308_vm0, %v3143_v32 }
  0x17   : > { %v3312_v19 = vld [vmem:[%s3252_s24 + $0x141] sm:$0xff]  ;;  %v3329_v23 = vld [vmem:[%s3252_s24 + $0x151] sm:$0xff]  ;;  %v3361_v30 = vld [vmem:[%s3252_s24 + $0x159] sm:$0xff] }
  0x18   : > { %v180_v20 = vld [vmem:[%s3252_s24 + $0x21] sm:$0xff]  ;;  %v3332_v24 = vld [vmem:[%s3252_s24 + $0x31] sm:$0xff]  ;;  %v3364_v31 = vld [vmem:[%s3252_s24 + $0x39] sm:$0xff] }
  0x19   : > { %v3379_v33 = vld [vmem:[%s3252_s24 + $0xa9] sm:$0xff]  ;;  %v3399_v37 = vld [vmem:[%s3252_s24 + $0xb1] sm:$0xff]  ;;  %v144_v41 = vld [vmem:[%s3252_s24] sm:$0xff] }
  0x1a   : > { %2691 = vmatmul.msk.f32.gmra.mxu1 %vm211_vm1, %v3272_v9  ;;  %v3382_v34 = vld [vmem:[%s3252_s24 + $0x109] sm:$0xff]  ;;  %v3402_v38 = vld [vmem:[%s3252_s24 + $0x111] sm:$0xff]  ;;  %v2782_v46 = vld [vmem:[%s3252_s24 + $0x20] sm:$0xff] }
  0x1b   : > { %2699 = vmatmul.msk.f32.gmra.mxu2 %vm211_vm1, %v3275_v10  ;;  %v3385_v35 = vld [vmem:[%s3252_s24 + $0x169] sm:$0xff]  ;;  %v3405_v39 = vld [vmem:[%s3252_s24 + $0x171] sm:$0xff]  ;;  %v3433_v47 = vld [vmem:[%s3252_s24 + $0x1a] sm:$0xff] }
  0x1c   : > { %2707 = vmatmul.msk.f32.gmra.mxu3 %vm211_vm1, %v3278_v11  ;;  %v3388_v36 = vld [vmem:[%s3252_s24 + $0x49] sm:$0xff]  ;;  %v3408_v40 = vld [vmem:[%s3252_s24 + $0x51] sm:$0xff]  ;;  %v3473_v53 = vld [vmem:[%s3252_s24 + $0x3a] sm:$0xff] }
  0x1d   : > { %2683 = vmatmul.msk.f32.gmra.mxu0 %vm211_vm1, %v178_v12  ;;  %v637_v42 = vld [vmem:[%s3252_s24 + $0x2] sm:$0xff]  ;;  %v2781_v43 = vld [vmem:[%s3252_s24 + $0x18] sm:$0xff]  ;;  %v638_v45 = vld [vmem:[%s3252_s24 + $0xa] sm:$0xff] }
  0x1e   : > { %v145_v44 = vld [vmem:[%s3252_s24 + $0x8] sm:$0xff]  ;;  %v3436_v48 = vld [vmem:[%s3252_s24 + $0x30] sm:$0xff]  ;;  %v3449_v50 = vld [vmem:[%s3252_s24 + $0x38] sm:$0xff] }
  0x1f   : > { %v3446_v49 = vld [vmem:[%s3252_s24 + $0x22] sm:$0xff]  ;;  %v3459_v51 = vld [vmem:[%s3252_s24 + $0x32] sm:$0xff]  ;;  %v3487_v55 = vld [vmem:[%s3252_s24 + $0x4a] sm:$0xff] }
  0x20   : > { %v3462_v52 = vld [vmem:[%s3252_s24 + $0x48] sm:$0xff]  ;;  %v3476_v54 = vld [vmem:[%s3252_s24 + $0x50] sm:$0xff]  ;;  %v3490_v56 = vld [vmem:[%s3252_s24 + $0x60] sm:$0xff] }
  0x21   : > { %v3501_v57 = vld [vmem:[%s3252_s24 + $0x52] sm:$0xff]  ;;  %v3504_v58 = vld [vmem:[%s3252_s24 + $0x68] sm:$0xff]  ;;  %v3542_v3 = vld [vmem:[%s3252_s24 + $0x80] sm:$0xff] }
  0x22   : > { %2692 = vmatmul.msk.f32.gmra.mxu1 %vm211_vm1, %v3289_v13  ;;  %4406 = vst [vmem:[#allocation2_spill] sm:$0xff] %v3504_v58  ;;  %v3517_v60 = vld [vmem:[%s3252_s24 + $0x62] sm:$0xff]  ;;  %v3520_v61 = vld [vmem:[%s3252_s24 + $0x78] sm:$0xff]  ;;  %v3539_v2 = vld [vmem:[%s3252_s24 + $0x6a] sm:$0xff] }
  0x23   : > { %2700 = vmatmul.msk.f32.gmra.mxu2 %vm211_vm1, %v3292_v14  ;;  %4407 = vst [vmem:[#allocation3_spill] sm:$0xff] %v3520_v61  ;;  %v3561_v12 = vld [vmem:[%s3252_s24 + $0x7a] sm:$0xff]  ;;  %v3583_v26 = vld [vmem:[%s3252_s24 + $0x82] sm:$0xff] }
  0x24   : > { %2708 = vmatmul.msk.f32.gmra.mxu3 %vm211_vm1, %v3295_v15  ;;  %4409 = vst [vmem:[#allocation5_spill] sm:$0xff] %v3539_v2  ;;  %v3586_v27 = vld [vmem:[%s3252_s24 + $0x98] sm:$0xff] }
  0x25   : > { %2684 = vmatmul.msk.f32.gmra.mxu0 %vm211_vm1, %v179_v16  ;;  %4410 = vst [vmem:[#allocation6_spill] sm:$0xff] %v3542_v3 }
  0x26   : > { %4412 = vst [vmem:[#allocation8_spill] sm:$0xff] %v3561_v12 }
  0x27   : > { %4415 = vst [vmem:[#allocation11_spill] sm:$0xff] %v3583_v26 }
  0x28   : > { %4416 = vst [vmem:[#allocation12_spill] sm:$0xff] %v3586_v27 }
  0x2a   : > { %2693 = vmatmul.msk.f32.gmra.mxu1 %vm211_vm1, %v3306_v17 }
  0x2b   : > { %2701 = vmatmul.msk.f32.gmra.mxu2 %vm211_vm1, %v3309_v18 }
  0x2c   : > { %2709 = vmatmul.msk.f32.gmra.mxu3 %vm211_vm1, %v3312_v19 }
  0x2d   : > { %2685 = vmatmul.msk.f32.gmra.mxu0 %vm211_vm1, %v180_v20 }
  0x32   : > { %2694 = vmatmul.msk.f32.gmra.mxu1 %vm211_vm1, %v3323_v21 }
  0x33   : > { %2702 = vmatmul.msk.f32.gmra.mxu2 %vm211_vm1, %v3326_v22 }
  0x34   : > { %2710 = vmatmul.msk.f32.gmra.mxu3 %vm211_vm1, %v3329_v23 }
  0x35   : > { %2686 = vmatmul.msk.f32.gmra.mxu0 %vm211_vm1, %v3332_v24 }
  0x3a   : > { %2695 = vmatmul.msk.f32.gmra.mxu1 %vm211_vm1, %v3355_v28 }
  0x3b   : > { %2703 = vmatmul.msk.f32.gmra.mxu2 %vm211_vm1, %v3358_v29 }
  0x3c   : > { %2711 = vmatmul.msk.f32.gmra.mxu3 %vm211_vm1, %v3361_v30 }
  0x3d   : > { %2687 = vmatmul.msk.f32.gmra.mxu0 %vm211_vm1, %v3364_v31 }
  0x42   : > { %2696 = vmatmul.msk.f32.gmra.mxu1 %vm211_vm1, %v3379_v33 }
  0x43   : > { %2704 = vmatmul.msk.f32.gmra.mxu2 %vm211_vm1, %v3382_v34 }
  0x44   : > { %2712 = vmatmul.msk.f32.gmra.mxu3 %vm211_vm1, %v3385_v35 }
  0x45   : > { %2688 = vmatmul.msk.f32.gmra.mxu0 %vm211_vm1, %v3388_v36 }
  0x4a   : > { %2697 = vmatmul.msk.f32.gmra.mxu1 %vm211_vm1, %v3399_v37 }
  0x4b   : > { %2705 = vmatmul.msk.f32.gmra.mxu2 %vm211_vm1, %v3402_v38 }
  0x4c   : > { %2713 = vmatmul.msk.f32.gmra.mxu3 %vm211_vm1, %v3405_v39 }
  0x4d   : > { %2689 = vmatmul.msk.f32.gmra.mxu0 %vm211_vm1, %v3408_v40 }
  0x52   : > { %2715 = vmatmul.msk.f32.vlgmr.msrb.gmra.mxu1 %vm211_vm1, %v144_v41 }
  0x53   : > { %2749 = vmatmul.msk.f32.vlgmr.msrb.gmra.mxu2 %vm211_vm1, %v637_v42 }
  0x54   : > { %2815 = vmatmul.msk.f32.vlgmr.msrb.gmra.mxu3 %vm211_vm1, %v2781_v43 }
  0x55   : > { %2881 = vmatmul.msk.f32.vlgmr.msrb.gmra.mxu0 %vm211_vm1, %v179_v16 }
  0x5a   : > { %2716 = vmatmul.msk.f32.gmra.mxu1 %vm211_vm1, %v145_v44  ;;  %v3608_v44 = vld [vmem:[%s3252_s24 + $0xa8] sm:$0xff] }
  0x5b   : > { %2750 = vmatmul.msk.f32.gmra.mxu2 %vm211_vm1, %v638_v45  ;;  %4419 = vst [vmem:[#allocation15_spill] sm:$0xff] %v3608_v44 }
  0x5c   : > { %2816 = vmatmul.msk.f32.gmra.mxu3 %vm211_vm1, %v2782_v46 }
  0x5d   : > { %2882 = vmatmul.msk.f32.gmra.mxu0 %vm211_vm1, %v180_v20 }
  0x62   : > { %2717 = vmatmul.msk.f32.gmra.mxu1 %vm211_vm1, %v2781_v43  ;;  %v3605_v43 = vld [vmem:[%s3252_s24 + $0x92] sm:$0xff] }
  0x63   : > { %2751 = vmatmul.msk.f32.gmra.mxu2 %vm211_vm1, %v3433_v47  ;;  %4418 = vst [vmem:[#allocation14_spill] sm:$0xff] %v3605_v43 }
  0x64   : > { %2817 = vmatmul.msk.f32.gmra.mxu3 %vm211_vm1, %v3436_v48 }
  0x65   : > { %2883 = vmatmul.msk.f32.gmra.mxu0 %vm211_vm1, %v3332_v24 }
  0x6a   : > { %2718 = vmatmul.msk.f32.gmra.mxu1 %vm211_vm1, %v2782_v46 }
  0x6b   : > { %2752 = vmatmul.msk.f32.gmra.mxu2 %vm211_vm1, %v3446_v49 }
  0x6c   : > { %2818 = vmatmul.msk.f32.gmra.mxu3 %vm211_vm1, %v3449_v50 }
  0x6d   : > { %2884 = vmatmul.msk.f32.gmra.mxu0 %vm211_vm1, %v3364_v31 }
  0x72   : > { %2719 = vmatmul.msk.f32.gmra.mxu1 %vm211_vm1, %v3436_v48 }
  0x73   : > { %2753 = vmatmul.msk.f32.gmra.mxu2 %vm211_vm1, %v3459_v51 }
  0x74   : > { %2819 = vmatmul.msk.f32.gmra.mxu3 %vm211_vm1, %v3462_v52 }
  0x75   : > { %2885 = vmatmul.msk.f32.gmra.mxu0 %vm211_vm1, %v3388_v36 }
  0x7a   : > { %2720 = vmatmul.msk.f32.gmra.mxu1 %vm211_vm1, %v3449_v50 }
  0x7b   : > { %2754 = vmatmul.msk.f32.gmra.mxu2 %vm211_vm1, %v3473_v53 }
  0x7c   : > { %2820 = vmatmul.msk.f32.gmra.mxu3 %vm211_vm1, %v3476_v54 }
  0x7d   : > { %2886 = vmatmul.msk.f32.gmra.mxu0 %vm211_vm1, %v3408_v40 }
  0x82   : > { %2721 = vmatmul.msk.f32.gmra.mxu1 %vm211_vm1, %v3462_v52 }
  0x83   : > { %2755 = vmatmul.msk.f32.gmra.mxu2 %vm211_vm1, %v3487_v55 }
  0x84   : > { %2821 = vmatmul.msk.f32.gmra.mxu3 %vm211_vm1, %v3490_v56 }
  0x85   : > { %2887 = vmatmul.msk.f32.gmra.mxu0 %vm211_vm1, %v3255_v5 }
  0x8a   : > { %2722 = vmatmul.msk.f32.gmra.mxu1 %vm211_vm1, %v3476_v54 }
  0x8b   : > { %2756 = vmatmul.msk.f32.gmra.mxu2 %vm211_vm1, %v3501_v57 }
  0x8c   : > { %2822 = vmatmul.msk.f32.gmra.mxu3 %vm211_vm1, %v3504_v58 }
  0x8d   : > { %2888 = vmatmul.msk.f32.gmra.mxu0 %vm211_vm1, %v3272_v9 }
  0x8f   : > { %v3514_v59 = vpop.f32.mrf.mxu1 }
  0x92   : > { %v3522_v62 = vpop.f32.mrf.mxu0  ;;  %2723 = vmatmul.msk.f32.gmra.mxu1 %vm211_vm1, %v3490_v56 }
  0x93   : > { %2757 = vmatmul.msk.f32.gmra.mxu2 %vm211_vm1, %v3517_v60 }
  0x94   : > { %2823 = vmatmul.msk.f32.gmra.mxu3 %vm211_vm1, %v3520_v61 }
  0x95   : > { %2889 = vmatmul.msk.f32.gmra.mxu0 %vm211_vm1, %v3289_v13  ;;  %v3564_v13 = vld [vmem:[%s3252_s24 + $0x90] sm:$0xff] }
  0x96   : > { %v3532_v63 = vpop.f32.mrf.mxu2  ;;  %4413 = vst [vmem:[#allocation9_spill] sm:$0xff] %v3564_v13 }
  0x97   : > { %v3534_v0 = vpop.f32.mrf.mxu3  ;;  %v3536_v1 = vpop.f32.mrf.mxu1 }
  0x98   : > { %4408 = vst [vmem:[#allocation4_spill] sm:$0xff] %v3534_v0 }
  0x9a   : > { %v3544_v4 = vpop.f32.mrf.mxu0  ;;  %2724 = vmatmul.msk.f32.gmra.mxu1 %vm211_vm1, %v3504_v58  ;;  %v3709_v58 = vld [vmem:[%s3252_s24 + $0xe0] sm:$0xff] }
  0x9b   : > { %2758 = vmatmul.msk.f32.gmra.mxu2 %vm211_vm1, %v3539_v2  ;;  %v3706_v2 = vld [vmem:[%s3252_s24 + $0xca] sm:$0xff] }
  0x9c   : > { %2824 = vmatmul.msk.f32.gmra.mxu3 %vm211_vm1, %v3542_v3 }
  0x9d   : > { %2890 = vmatmul.msk.f32.gmra.mxu0 %vm211_vm1, %v3306_v17 }
  0x9e   : > { %v3554_v5 = vpop.f32.mrf.mxu2 }
  0x9f   : > { %v3556_v8 = vpop.f32.mrf.mxu3  ;;  %v3558_v9 = vpop.f32.mrf.mxu1 }
  0xa0   : > { %4411 = vst [vmem:[#allocation7_spill] sm:$0xff] %v3556_v8  ;;  %v3630_v8 = vld [vmem:[%s3252_s24 + $0xb0] sm:$0xff] }
  0xa1   : > { %4423 = vst [vmem:[#allocation19_spill] sm:$0xff] %v3630_v8 }
  0xa2   : > { %v3566_v16 = vpop.f32.mrf.mxu0  ;;  %2725 = vmatmul.msk.f32.gmra.mxu1 %vm211_vm1, %v3520_v61  ;;  %v3694_v61 = vld [vmem:[%s3252_s24 + $0xd8] sm:$0xff] }
  0xa3   : > { %2759 = vmatmul.msk.f32.gmra.mxu2 %vm211_vm1, %v3561_v12 }
  0xa4   : > { %2825 = vmatmul.msk.f32.gmra.mxu3 %vm211_vm1, %v3564_v13 }
  0xa5   : > { %2891 = vmatmul.msk.f32.gmra.mxu0 %vm211_vm1, %v3323_v21 }
  0xa6   : > { %v3576_v17 = vpop.f32.mrf.mxu2 }
  0xa7   : > { %v3578_v20 = vpop.f32.mrf.mxu3  ;;  %v3580_v25 = vpop.f32.mrf.mxu1 }
  0xa8   : > { %4414 = vst [vmem:[#allocation10_spill] sm:$0xff] %v3578_v20  ;;  %v3627_v20 = vld [vmem:[%s3252_s24 + $0x9a] sm:$0xff] }
  0xa9   : > { %4422 = vst [vmem:[#allocation18_spill] sm:$0xff] %v3627_v20 }
  0xaa   : > { %v3588_v32 = vpop.f32.mrf.mxu0  ;;  %2726 = vmatmul.msk.f32.gmra.mxu1 %vm211_vm1, %v3542_v3  ;;  %v3671_v3 = vld [vmem:[%s3252_s24 + $0xb2] sm:$0xff] }
  0xab   : > { %2760 = vmatmul.msk.f32.gmra.mxu2 %vm211_vm1, %v3583_v26  ;;  %4430 = vst [vmem:[#allocation26_spill] sm:$0xff] %v3671_v3 }
  0xac   : > { %2826 = vmatmul.msk.f32.gmra.mxu3 %vm211_vm1, %v3586_v27 }
  0xad   : > { %2892 = vmatmul.msk.f32.gmra.mxu0 %vm211_vm1, %v3355_v28 }
  0xae   : > { %v3598_v21 = vpop.f32.mrf.mxu2 }
  0xaf   : > { %v3600_v41 = vpop.f32.mrf.mxu3  ;;  %v3602_v42 = vpop.f32.mrf.mxu1 }
  0xb0   : > { %4417 = vst [vmem:[#allocation13_spill] sm:$0xff] %v3600_v41 }
  0xb2   : > { %v3610_v45 = vpop.f32.mrf.mxu0  ;;  %2727 = vmatmul.msk.f32.gmra.mxu1 %vm211_vm1, %v3564_v13  ;;  %v3649_v13 = vld [vmem:[%s3252_s24 + $0xaa] sm:$0xff] }
  0xb3   : > { %2761 = vmatmul.msk.f32.gmra.mxu2 %vm211_vm1, %v3605_v43  ;;  %4426 = vst [vmem:[#allocation22_spill] sm:$0xff] %v3649_v13 }
  0xb4   : > { %2827 = vmatmul.msk.f32.gmra.mxu3 %vm211_vm1, %v3608_v44 }
  0xb5   : > { %2893 = vmatmul.msk.f32.gmra.mxu0 %vm211_vm1, %v3379_v33 }
  0xb6   : > { %v3620_v28 = vpop.f32.mrf.mxu2 }
  0xb7   : > { %4420 = vst [vmem:[#allocation16_spill] sm:$0xff] %v3620_v28  ;;  %v3622_v46 = vpop.f32.mrf.mxu3  ;;  %v3624_v41 = vpop.f32.mrf.mxu1 }
  0xb8   : > { %4421 = vst [vmem:[#allocation17_spill] sm:$0xff] %v3622_v46 }
  0xba   : > { %v3632_v0 = vpop.f32.mrf.mxu0  ;;  %2728 = vmatmul.msk.f32.gmra.mxu1 %vm211_vm1, %v3586_v27  ;;  %v3652_v27 = vld [vmem:[%s3252_s24 + $0xc0] sm:$0xff] }
  0xbb   : > { %2762 = vmatmul.msk.f32.gmra.mxu2 %vm211_vm1, %v3627_v20  ;;  %4427 = vst [vmem:[#allocation23_spill] sm:$0xff] %v3652_v27 }
  0xbc   : > { %2828 = vmatmul.msk.f32.gmra.mxu3 %vm211_vm1, %v3630_v8 }
  0xbd   : > { %2894 = vmatmul.msk.f32.gmra.mxu0 %vm211_vm1, %v3399_v37 }
  0xbe   : > { %v3642_v33 = vpop.f32.mrf.mxu2 }
  0xbf   : > { %4424 = vst [vmem:[#allocation20_spill] sm:$0xff] %v3642_v33  ;;  %v3644_v46 = vpop.f32.mrf.mxu3  ;;  %v3646_v43 = vpop.f32.mrf.mxu1 }
  0xc0   : > { %4425 = vst [vmem:[#allocation21_spill] sm:$0xff] %v3644_v46 }
  0xc2   : > { %v3654_v26 = vpop.f32.mrf.mxu0  ;;  %2729 = vmatmul.msk.f32.gmra.mxu1 %vm211_vm1, %v3608_v44  ;;  %v3674_v44 = vld [vmem:[%s3252_s24 + $0xc8] sm:$0xff] }
  0xc3   : > { %2763 = vmatmul.msk.f32.gmra.mxu2 %vm211_vm1, %v3649_v13 }
  0xc4   : > { %2829 = vmatmul.msk.f32.gmra.mxu3 %vm211_vm1, %v3652_v27 }
  0xc5   : > { %2895 = vmatmul.msk.f32.gmra.mxu0 %vm211_vm1, %v3258_v6 }
  0xc6   : > { %v3664_v37 = vpop.f32.mrf.mxu2 }
  0xc7   : > { %4428 = vst [vmem:[#allocation24_spill] sm:$0xff] %v3664_v37  ;;  %v3666_v46 = vpop.f32.mrf.mxu3  ;;  %v3668_v20 = vpop.f32.mrf.mxu1  ;;  %v3691_v37 = vld [vmem:[%s3252_s24 + $0xc2] sm:$0xff] }
  0xc8   : > { %4429 = vst [vmem:[#allocation25_spill] sm:$0xff] %v3666_v46 }
  0xc9   : > { %4433 = vst [vmem:[#allocation29_spill] sm:$0xff] %v3691_v37 }
  0xca   : > { %v3676_v12 = vpop.f32.mrf.mxu0  ;;  %2730 = vmatmul.msk.f32.gmra.mxu1 %vm211_vm1, %v3630_v8 }
  0xcb   : > { %2764 = vmatmul.msk.f32.gmra.mxu2 %vm211_vm1, %v3671_v3 }
  0xcc   : > { %2830 = vmatmul.msk.f32.gmra.mxu3 %vm211_vm1, %v3674_v44 }
  0xcd   : > { %2896 = vmatmul.msk.f32.gmra.mxu0 %vm211_vm1, %v3275_v10 }
  0xce   : > { %v3686_v6 = vpop.f32.mrf.mxu2 }
  0xcf   : > { %4431 = vst [vmem:[#allocation27_spill] sm:$0xff] %v3686_v6  ;;  %v3688_v46 = vpop.f32.mrf.mxu3  ;;  %v541_v13 = vpop.f32.mrf.mxu1 }
  0xd0   : > { %4432 = vst [vmem:[#allocation28_spill] sm:$0xff] %v3688_v46  ;;  %v542_v10 = vadd.f32 %v541_v13, %v3522_v62 }
  0xd2   : > { %v1344_v8 = vpop.f32.mrf.mxu0  ;;  %2731 = vmatmul.msk.f32.gmra.mxu1 %vm211_vm1, %v3652_v27 }
  0xd3   : > { %2765 = vmatmul.msk.f32.gmra.mxu2 %vm211_vm1, %v3691_v37 }
  0xd4   : > { %2831 = vmatmul.msk.f32.gmra.mxu3 %vm211_vm1, %v3694_v61 }
  0xd5   : > { %2897 = vmatmul.msk.f32.gmra.mxu0 %vm211_vm1, %v3292_v14 }
  0xd6   : > { %v787_v46 = vpop.f32.mrf.mxu2 }
  0xd7   : > { %v883_v3 = vadd.f32 %v787_v46, %v542_v10  ;;  %v1066_v6 = vpop.f32.mrf.mxu3  ;;  %v544_v33 = vpop.f32.mrf.mxu1 }
  0xd8   : > { %v545_v14 = vadd.f32 %v544_v33, %v3544_v4 }
  0xd9   : > { %v1162_v27 = vadd.f32 %v1066_v6, %v883_v3  ;;  %v3726_v6 = vld [vmem:[%s3252_s24 + $0xf0] sm:$0xff] }
  0xda   : > { %v1347_v37 = vpop.f32.mrf.mxu0  ;;  %2732 = vmatmul.msk.f32.gmra.mxu1 %vm211_vm1, %v3674_v44 }
  0xdb   : > { %v3711_v28 = vadd.f32 %v1344_v8, %v1162_v27  ;;  %2766 = vmatmul.msk.f32.gmra.mxu2 %vm211_vm1, %v3706_v2  ;;  %v3723_v27 = vld [vmem:[%s3252_s24 + $0xda] sm:$0xff] }
  0xdc   : > { %2832 = vmatmul.msk.f32.gmra.mxu3 %vm211_vm1, %v3709_v58 }
  0xdd   : > { %4434 = vst [vmem:[#allocation30_spill] sm:$0xff] %v3711_v28  ;;  %2898 = vmatmul.msk.f32.gmra.mxu0 %vm211_vm1, %v3309_v18 }
  0xde   : > { %v790_v62 = vpop.f32.mrf.mxu2 }
  0xdf   : > { %v884_v3 = vadd.f32 %v790_v62, %v545_v14  ;;  %v1069_v13 = vpop.f32.mrf.mxu3  ;;  %v547_v8 = vpop.f32.mrf.mxu1  ;;  %v3740_v62 = vld [vmem:[%s3252_s24 + $0xe2] sm:$0xff] }
  0xe0   : > { %v548_v18 = vadd.f32 %v547_v8, %v3566_v16 }
  0xe1   : > { %v1163_v46 = vadd.f32 %v1069_v13, %v884_v3  ;;  %v3743_v13 = vld [vmem:[%s3252_s24 + $0xf8] sm:$0xff] }
  0xe2   : > { %v1350_v10 = vpop.f32.mrf.mxu0  ;;  %2733 = vmatmul.msk.f32.gmra.mxu1 %vm211_vm1, %v3694_v61 }
  0xe3   : > { %v3728_v28 = vadd.f32 %v1347_v37, %v1163_v46  ;;  %2767 = vmatmul.msk.f32.gmra.mxu2 %vm211_vm1, %v3723_v27 }
  0xe4   : > { %2833 = vmatmul.msk.f32.gmra.mxu3 %vm211_vm1, %v3726_v6 }
  0xe5   : > { %4435 = vst [vmem:[#allocation31_spill] sm:$0xff] %v3728_v28  ;;  %2899 = vmatmul.msk.f32.gmra.mxu0 %vm211_vm1, %v3326_v22 }
  0xe6   : > { %v793_v4 = vpop.f32.mrf.mxu2 }
  0xe7   : > { %v885_v33 = vadd.f32 %v793_v4, %v548_v18  ;;  %v1072_v14 = vpop.f32.mrf.mxu3  ;;  %v550_v37 = vpop.f32.mrf.mxu1  ;;  %v3757_v4 = vld [vmem:[%s3252_s24 + $0xf2] sm:$0xff] }
  0xe8   : > { %v551_v22 = vadd.f32 %v550_v37, %v3588_v32 }
  0xe9   : > { %v1164_v3 = vadd.f32 %v1072_v14, %v885_v33  ;;  %v3760_v14 = vld [vmem:[%s3252_s24 + $0x108] sm:$0xff] }
  0xea   : > { %v1353_v46 = vpop.f32.mrf.mxu0  ;;  %2734 = vmatmul.msk.f32.gmra.mxu1 %vm211_vm1, %v3709_v58 }
  0xeb   : > { %v3745_v28 = vadd.f32 %v1350_v10, %v1164_v3  ;;  %2768 = vmatmul.msk.f32.gmra.mxu2 %vm211_vm1, %v3740_v62 }
  0xec   : > { %2834 = vmatmul.msk.f32.gmra.mxu3 %vm211_vm1, %v3743_v13 }
  0xed   : > { %4436 = vst [vmem:[#allocation32_spill] sm:$0xff] %v3745_v28  ;;  %2900 = vmatmul.msk.f32.gmra.mxu0 %vm211_vm1, %v3358_v29 }
  0xee   : > { %v796_v16 = vpop.f32.mrf.mxu2 }
  0xef   : > { %v886_v8 = vadd.f32 %v796_v16, %v551_v22  ;;  %v1075_v18 = vpop.f32.mrf.mxu3  ;;  %v553_v10 = vpop.f32.mrf.mxu1  ;;  %v3774_v16 = vld [vmem:[%s3252_s24 + $0xfa] sm:$0xff] }
  0xf0   : > { %v554_v29 = vadd.f32 %v553_v10, %v3610_v45 }
  0xf1   : > { %v1165_v33 = vadd.f32 %v1075_v18, %v886_v8  ;;  %v3777_v18 = vld [vmem:[%s3252_s24 + $0x110] sm:$0xff] }
  0xf2   : > { %v1356_v3 = vpop.f32.mrf.mxu0  ;;  %2735 = vmatmul.msk.f32.gmra.mxu1 %vm211_vm1, %v3726_v6 }
  0xf3   : > { %v3762_v28 = vadd.f32 %v1353_v46, %v1165_v33  ;;  %2769 = vmatmul.msk.f32.gmra.mxu2 %vm211_vm1, %v3757_v4 }
  0xf4   : > { %2835 = vmatmul.msk.f32.gmra.mxu3 %vm211_vm1, %v3760_v14 }
  0xf5   : > { %4437 = vst [vmem:[#allocation33_spill] sm:$0xff] %v3762_v28  ;;  %2901 = vmatmul.msk.f32.gmra.mxu0 %vm211_vm1, %v3382_v34 }
  0xf6   : > { %v799_v32 = vpop.f32.mrf.mxu2 }
  0xf7   : > { %v887_v37 = vadd.f32 %v799_v32, %v554_v29  ;;  %v1078_v22 = vpop.f32.mrf.mxu3  ;;  %v556_v46 = vpop.f32.mrf.mxu1  ;;  %v3791_v32 = vld [vmem:[%s3252_s24 + $0x10a] sm:$0xff] }
  0xf8   : > { %v557_v34 = vadd.f32 %v556_v46, %v3632_v0 }
  0xf9   : > { %v1166_v8 = vadd.f32 %v1078_v22, %v887_v37  ;;  %v3794_v22 = vld [vmem:[%s3252_s24 + $0x120] sm:$0xff] }
  0xfa   : > { %v1359_v33 = vpop.f32.mrf.mxu0  ;;  %2736 = vmatmul.msk.f32.gmra.mxu1 %vm211_vm1, %v3743_v13 }
  0xfb   : > { %v3779_v28 = vadd.f32 %v1356_v3, %v1166_v8  ;;  %2770 = vmatmul.msk.f32.gmra.mxu2 %vm211_vm1, %v3774_v16 }
  0xfc   : > { %2836 = vmatmul.msk.f32.gmra.mxu3 %vm211_vm1, %v3777_v18 }
  0xfd   : > { %4438 = vst [vmem:[#allocation34_spill] sm:$0xff] %v3779_v28  ;;  %2902 = vmatmul.msk.f32.gmra.mxu0 %vm211_vm1, %v3402_v38 }
  0xfe   : > { %v802_v45 = vpop.f32.mrf.mxu2 }
  0xff   : > { %v888_v10 = vadd.f32 %v802_v45, %v557_v34  ;;  %v1081_v29 = vpop.f32.mrf.mxu3  ;;  %v559_v3 = vpop.f32.mrf.mxu1  ;;  %v3808_v45 = vld [vmem:[%s3252_s24 + $0x112] sm:$0xff] }
 0x100   : > { %v560_v38 = vadd.f32 %v559_v3, %v3654_v26 }
 0x101   : > { %v1167_v37 = vadd.f32 %v1081_v29, %v888_v10  ;;  %v3811_v29 = vld [vmem:[%s3252_s24 + $0x128] sm:$0xff] }
 0x102   : > { %v1362_v8 = vpop.f32.mrf.mxu0  ;;  %2737 = vmatmul.msk.f32.gmra.mxu1 %vm211_vm1, %v3760_v14 }
 0x103   : > { %v3796_v28 = vadd.f32 %v1359_v33, %v1167_v37  ;;  %2771 = vmatmul.msk.f32.gmra.mxu2 %vm211_vm1, %v3791_v32 }
 0x104   : > { %2837 = vmatmul.msk.f32.gmra.mxu3 %vm211_vm1, %v3794_v22 }
 0x105   : > { %4439 = vst [vmem:[#allocation35_spill] sm:$0xff] %v3796_v28  ;;  %2903 = vmatmul.msk.f32.gmra.mxu0 %vm211_vm1, %v3261_v7 }
 0x106   : > { %v805_v0 = vpop.f32.mrf.mxu2 }
 0x107   : > { %v889_v46 = vadd.f32 %v805_v0, %v560_v38  ;;  %v1084_v34 = vpop.f32.mrf.mxu3  ;;  %v562_v33 = vpop.f32.mrf.mxu1  ;;  %v3825_v0 = vld [vmem:[%s3252_s24 + $0x122] sm:$0xff] }
 0x108   : > { %v563_v7 = vadd.f32 %v562_v33, %v3676_v12 }
 0x109   : > { %v1168_v10 = vadd.f32 %v1084_v34, %v889_v46  ;;  %v3828_v34 = vld [vmem:[%s3252_s24 + $0x138] sm:$0xff] }
 0x10a   : > { %v1365_v37 = vpop.f32.mrf.mxu0  ;;  %2738 = vmatmul.msk.f32.gmra.mxu1 %vm211_vm1, %v3777_v18 }
 0x10b   : > { %v3813_v28 = vadd.f32 %v1362_v8, %v1168_v10  ;;  %2772 = vmatmul.msk.f32.gmra.mxu2 %vm211_vm1, %v3808_v45 }
 0x10c   : > { %2838 = vmatmul.msk.f32.gmra.mxu3 %vm211_vm1, %v3811_v29 }
 0x10d   : > { %4440 = vst [vmem:[#allocation36_spill] sm:$0xff] %v3813_v28  ;;  %2904 = vmatmul.msk.f32.gmra.mxu0 %vm211_vm1, %v3278_v11 }
 0x10e   : > { %v808_v26 = vpop.f32.mrf.mxu2 }
 0x10f   : > { %v890_v3 = vadd.f32 %v808_v26, %v563_v7  ;;  %v1087_v38 = vpop.f32.mrf.mxu3  ;;  %v565_v8 = vpop.f32.mrf.mxu1  ;;  %v3842_v26 = vld [vmem:[%s3252_s24 + $0x12a] sm:$0xff] }
 0x110   : > { %v566_v11 = vadd.f32 %v565_v8, %v3514_v59 }
 0x111   : > { %v1169_v46 = vadd.f32 %v1087_v38, %v890_v3  ;;  %v3845_v38 = vld [vmem:[%s3252_s24 + $0x140] sm:$0xff] }
 0x112   : > { %v1368_v10 = vpop.f32.mrf.mxu0  ;;  %2739 = vmatmul.msk.f32.gmra.mxu1 %vm211_vm1, %v3794_v22 }
 0x113   : > { %v3830_v28 = vadd.f32 %v1365_v37, %v1169_v46  ;;  %2773 = vmatmul.msk.f32.gmra.mxu2 %vm211_vm1, %v3825_v0 }
 0x114   : > { %2839 = vmatmul.msk.f32.gmra.mxu3 %vm211_vm1, %v3828_v34 }
 0x115   : > { %4441 = vst [vmem:[#allocation37_spill] sm:$0xff] %v3830_v28  ;;  %2905 = vmatmul.msk.f32.gmra.mxu0 %vm211_vm1, %v3295_v15 }
 0x116   : > { %v811_v12 = vpop.f32.mrf.mxu2 }
 0x117   : > { %v891_v33 = vadd.f32 %v811_v12, %v566_v11  ;;  %v1090_v7 = vpop.f32.mrf.mxu3  ;;  %v568_v37 = vpop.f32.mrf.mxu1  ;;  %v3859_v12 = vld [vmem:[%s3252_s24 + $0x13a] sm:$0xff] }
 0x118   : > { %v569_v15 = vadd.f32 %v568_v37, %v3536_v1 }
 0x119   : > { %v1170_v3 = vadd.f32 %v1090_v7, %v891_v33  ;;  %v3862_v7 = vld [vmem:[%s3252_s24 + $0x150] sm:$0xff] }
 0x11a   : > { %v1371_v46 = vpop.f32.mrf.mxu0  ;;  %2740 = vmatmul.msk.f32.gmra.mxu1 %vm211_vm1, %v3811_v29 }
 0x11b   : > { %v3847_v28 = vadd.f32 %v1368_v10, %v1170_v3  ;;  %2774 = vmatmul.msk.f32.gmra.mxu2 %vm211_vm1, %v3842_v26 }
 0x11c   : > { %2840 = vmatmul.msk.f32.gmra.mxu3 %vm211_vm1, %v3845_v38 }
 0x11d   : > { %4442 = vst [vmem:[#allocation38_spill] sm:$0xff] %v3847_v28  ;;  %2906 = vmatmul.msk.f32.gmra.mxu0 %vm211_vm1, %v3312_v19 }
 0x11e   : > { %v814_v59 = vpop.f32.mrf.mxu2 }
 0x11f   : > { %v892_v8 = vadd.f32 %v814_v59, %v569_v15  ;;  %v1093_v11 = vpop.f32.mrf.mxu3  ;;  %v571_v10 = vpop.f32.mrf.mxu1  ;;  %v3876_v59 = vld [vmem:[%s3252_s24 + $0x142] sm:$0xff] }
 0x120   : > { %v572_v19 = vadd.f32 %v571_v10, %v3558_v9 }
 0x121   : > { %v1171_v33 = vadd.f32 %v1093_v11, %v892_v8  ;;  %v3879_v11 = vld [vmem:[%s3252_s24 + $0x158] sm:$0xff] }
 0x122   : > { %v1374_v3 = vpop.f32.mrf.mxu0  ;;  %2741 = vmatmul.msk.f32.gmra.mxu1 %vm211_vm1, %v3828_v34 }
 0x123   : > { %v3864_v28 = vadd.f32 %v1371_v46, %v1171_v33  ;;  %2775 = vmatmul.msk.f32.gmra.mxu2 %vm211_vm1, %v3859_v12 }
 0x124   : > { %2841 = vmatmul.msk.f32.gmra.mxu3 %vm211_vm1, %v3862_v7 }
 0x125   : > { %4443 = vst [vmem:[#allocation39_spill] sm:$0xff] %v3864_v28  ;;  %2907 = vmatmul.msk.f32.gmra.mxu0 %vm211_vm1, %v3329_v23 }
 0x126   : > { %v817_v1 = vpop.f32.mrf.mxu2 }
 0x127   : > { %v893_v37 = vadd.f32 %v817_v1, %v572_v19  ;;  %v1096_v15 = vpop.f32.mrf.mxu3  ;;  %v574_v46 = vpop.f32.mrf.mxu1  ;;  %v3893_v1 = vld [vmem:[%s3252_s24 + $0x152] sm:$0xff] }
 0x128   : > { %v575_v23 = vadd.f32 %v574_v46, %v3580_v25 }
 0x129   : > { %v1172_v8 = vadd.f32 %v1096_v15, %v893_v37  ;;  %v3896_v15 = vld [vmem:[%s3252_s24 + $0x168] sm:$0xff] }
 0x12a   : > { %v1377_v33 = vpop.f32.mrf.mxu0  ;;  %2742 = vmatmul.msk.f32.gmra.mxu1 %vm211_vm1, %v3845_v38 }
 0x12b   : > { %v3881_v28 = vadd.f32 %v1374_v3, %v1172_v8  ;;  %2776 = vmatmul.msk.f32.gmra.mxu2 %vm211_vm1, %v3876_v59 }
 0x12c   : > { %2842 = vmatmul.msk.f32.gmra.mxu3 %vm211_vm1, %v3879_v11 }
 0x12d   : > { %4444 = vst [vmem:[#allocation40_spill] sm:$0xff] %v3881_v28  ;;  %2908 = vmatmul.msk.f32.gmra.mxu0 %vm211_vm1, %v3361_v30 }
 0x12e   : > { %v820_v9 = vpop.f32.mrf.mxu2 }
 0x12f   : > { %v894_v10 = vadd.f32 %v820_v9, %v575_v23  ;;  %v1099_v19 = vpop.f32.mrf.mxu3  ;;  %v577_v3 = vpop.f32.mrf.mxu1  ;;  %v3910_v9 = vld [vmem:[%s3252_s24 + $0x15a] sm:$0xff] }
 0x130   : > { %v578_v30 = vadd.f32 %v577_v3, %v3602_v42  ;;  %4446 = vst [vmem:[#allocation42_spill] sm:$0xff] %v3910_v9 }
 0x131   : > { %v1173_v37 = vadd.f32 %v1099_v19, %v894_v10  ;;  %v3913_v19 = vld [vmem:[%s3252_s24 + $0x170] sm:$0xff] }
 0x132   : > { %v1380_v8 = vpop.f32.mrf.mxu0  ;;  %2743 = vmatmul.msk.f32.gmra.mxu1 %vm211_vm1, %v3862_v7 }
 0x133   : > { %v3898_v28 = vadd.f32 %v1377_v33, %v1173_v37  ;;  %2777 = vmatmul.msk.f32.gmra.mxu2 %vm211_vm1, %v3893_v1 }
 0x134   : > { %2843 = vmatmul.msk.f32.gmra.mxu3 %vm211_vm1, %v3896_v15 }
 0x135   : > { %4445 = vst [vmem:[#allocation41_spill] sm:$0xff] %v3898_v28  ;;  %2909 = vmatmul.msk.f32.gmra.mxu0 %vm211_vm1, %v3385_v35 }
 0x136   : > { %v823_v25 = vpop.f32.mrf.mxu2 }
 0x137   : > { %v895_v46 = vadd.f32 %v823_v25, %v578_v30  ;;  %v1102_v23 = vpop.f32.mrf.mxu3  ;;  %v580_v33 = vpop.f32.mrf.mxu1 }
 0x138   : > { %v581_v35 = vadd.f32 %v580_v33, %v3624_v41 }
 0x139   : > { %v1174_v10 = vadd.f32 %v1102_v23, %v895_v46  ;;  %v3930_v23 = vld [vmem:[%s3252_s24 + $0x180] sm:$0xff] }
 0x13a   : > { %v1383_v37 = vpop.f32.mrf.mxu0  ;;  %2744 = vmatmul.msk.f32.gmra.mxu1 %vm211_vm1, %v3879_v11 }
 0x13b   : > { %v3915_v28 = vadd.f32 %v1380_v8, %v1174_v10  ;;  %2778 = vmatmul.msk.f32.gmra.mxu2 %vm211_vm1, %v3910_v9  ;;  %v3927_v8 = vld [vmem:[%s3252_s24 + $0x16a] sm:$0xff] }
 0x13c   : > { %2844 = vmatmul.msk.f32.gmra.mxu3 %vm211_vm1, %v3913_v19  ;;  %4448 = vst [vmem:[#allocation44_spill] sm:$0xff] %v3927_v8 }
 0x13d   : > { %4447 = vst [vmem:[#allocation43_spill] sm:$0xff] %v3915_v28  ;;  %2910 = vmatmul.msk.f32.gmra.mxu0 %vm211_vm1, %v3405_v39  ;;  %v3933_v28 = vld [vmem:[%s3252_s24 + $0x181] sm:$0xff] }
 0x13e   : > { %v826_v42 = vpop.f32.mrf.mxu2 }
 0x13f   : > { %v896_v3 = vadd.f32 %v826_v42, %v581_v35  ;;  %v1105_v30 = vpop.f32.mrf.mxu3  ;;  %v583_v25 = vpop.f32.mrf.mxu1 }
 0x140   : > { %v584_v39 = vadd.f32 %v583_v25, %v3646_v43 }
 0x141   : > { %v1175_v46 = vadd.f32 %v1105_v30, %v896_v3  ;;  %v3950_v30 = vld [vmem:[%s3252_s24 + $0x188] sm:$0xff] }
 0x142   : > { %v1386_v10 = vpop.f32.mrf.mxu0  ;;  %2745 = vmatmul.msk.f32.gmra.mxu1 %vm211_vm1, %v3896_v15 }
 0x143   : > { %v3935_v9 = vadd.f32 %v1383_v37, %v1175_v46  ;;  %2779 = vmatmul.msk.f32.gmra.mxu2 %vm211_vm1, %v3927_v8  ;;  %v3947_v37 = vld [vmem:[%s3252_s24 + $0x172] sm:$0xff] }
 0x144   : > { %2845 = vmatmul.msk.f32.gmra.mxu3 %vm211_vm1, %v3930_v23 }
 0x145   : > { %4449 = vst [vmem:[#allocation45_spill] sm:$0xff] %v3935_v9  ;;  %2911 = vmatmul.msk.f32.gmra.mxu0 %vm211_vm1, %v3933_v28  ;;  %v3953_v9 = vld [vmem:[%s3252_s24 + $0x189] sm:$0xff] }
 0x146   : > { %v829_v41 = vpop.f32.mrf.mxu2 }
 0x147   : > { %v897_v33 = vadd.f32 %v829_v41, %v584_v39  ;;  %v1108_v35 = vpop.f32.mrf.mxu3  ;;  %v586_v42 = vpop.f32.mrf.mxu1 }
 0x148   : > { %v587_v43 = vadd.f32 %v586_v42, %v3668_v20 }
 0x149   : > { %v1176_v3 = vadd.f32 %v1108_v35, %v897_v33 }
 0x14a   : > { %v1389_v46 = vpop.f32.mrf.mxu0  ;;  %2746 = vmatmul.msk.f32.gmra.mxu1 %vm211_vm1, %v3913_v19 }
 0x14b   : > { %v3955_v8 = vadd.f32 %v1386_v10, %v1176_v3  ;;  %2780 = vmatmul.msk.f32.gmra.mxu2 %vm211_vm1, %v3947_v37 }
 0x14c   : > { %2846 = vmatmul.msk.f32.gmra.mxu3 %vm211_vm1, %v3950_v30 }
 0x14d   : > { %2912 = vmatmul.msk.f32.gmra.mxu0 %vm211_vm1, %v3953_v9 }
 0x14e   : > { %v832_v25 = vpop.f32.mrf.mxu2 }
 0x14f   : > { %v898_v39 = vadd.f32 %v832_v25, %v587_v43  ;;  %v1111_v41 = vpop.f32.mrf.mxu3  ;;  %v589_v33 = vpop.f32.mrf.mxu1 }
 0x150   : > { %v590_v20 = vadd.f32 %v589_v33, %v3532_v63 }
 0x151   : > { %v1177_v10 = vadd.f32 %v1111_v41, %v898_v39 }
 0x152   : > { %v1392_v35 = vpop.f32.mrf.mxu0  ;;  %2947 = vmatmul.msk.f32.vlgmr.msra.gmra.mxu1 %vm211_vm1, %v3433_v47 }
 0x153   : > { %v3966_v3 = vadd.f32 %v1389_v46, %v1177_v10  ;;  %3013 = vmatmul.msk.f32.vlgmr.msra.gmra.mxu2 %vm211_vm1, %v3436_v48 }
 0x154   : > { %3079 = vmatmul.msk.f32.vlgmr.msra.gmra.mxu3 %vm211_vm1, %v3332_v24 }
 0x155   : > { %3145 = vmatmul.msk.f32.vlgmr.msra.gmra.mxu0 %vm211_vm1, %v3459_v51 }
 0x156   : > { %v835_v42 = vpop.f32.mrf.mxu2 }
 0x157   : > { %v899_v43 = vadd.f32 %v835_v42, %v590_v20  ;;  %v1114_v25 = vpop.f32.mrf.mxu3  ;;  %v592_v39 = vpop.f32.mrf.mxu1 }
 0x158   : > { %v593_v24 = vadd.f32 %v592_v39, %v3554_v5 }
 0x159   : > { %v1178_v46 = vadd.f32 %v1114_v25, %v899_v43 }
 0x15a   : > { %v1395_v41 = vpop.f32.mrf.mxu0  ;;  %2948 = vmatmul.msk.f32.gmra.mxu1 %vm211_vm1, %v3446_v49 }
 0x15b   : > { %v3977_v10 = vadd.f32 %v1392_v35, %v1178_v46  ;;  %3014 = vmatmul.msk.f32.gmra.mxu2 %vm211_vm1, %v3449_v50 }
 0x15c   : > { %3080 = vmatmul.msk.f32.gmra.mxu3 %vm211_vm1, %v3364_v31 }
 0x15d   : > { %3146 = vmatmul.msk.f32.gmra.mxu0 %vm211_vm1, %v3473_v53 }
 0x15e   : > { %v838_v47 = vpop.f32.mrf.mxu2 }
 0x15f   : > { %v900_v48 = vadd.f32 %v838_v47, %v593_v24  ;;  %v1117_v63 = vpop.f32.mrf.mxu3  ;;  %v595_v33 = vpop.f32.mrf.mxu1  ;;  %v3049_v47 = vld [vmem:[%s3252_s24 + $0x61] sm:$0xff] }
 0x160   : > { %v596_v31 = vadd.f32 %v595_v33, %v3576_v17 }
 0x161   : > { %v1179_v35 = vadd.f32 %v1117_v63, %v900_v48 }
 0x162   : > { %v1398_v20 = vpop.f32.mrf.mxu0  ;;  %2949 = vmatmul.msk.f32.gmra.mxu1 %vm211_vm1, %v3459_v51 }
 0x163   : > { %v3988_v42 = vadd.f32 %v1395_v41, %v1179_v35  ;;  %3015 = vmatmul.msk.f32.gmra.mxu2 %vm211_vm1, %v3462_v52 }
 0x164   : > { %3081 = vmatmul.msk.f32.gmra.mxu3 %vm211_vm1, %v3388_v36 }
 0x165   : > { %3147 = vmatmul.msk.f32.gmra.mxu0 %vm211_vm1, %v3487_v55 }
 0x166   : > { %v841_v49 = vpop.f32.mrf.mxu2 }
 0x167   : > { %v901_v50 = vadd.f32 %v841_v49, %v596_v31  ;;  %v1120_v5 = vpop.f32.mrf.mxu3  ;;  %v598_v43 = vpop.f32.mrf.mxu1  ;;  %v3050_v31 = vld [vmem:[%s3252_s24 + $0x69] sm:$0xff] }
 0x168   : > { %v599_v36 = vadd.f32 %v598_v43, %v3598_v21 }
 0x169   : > { %v1180_v25 = vadd.f32 %v1120_v5, %v901_v50  ;;  %v4453_v5 = vld [vmem:[#allocation20_spill] sm:$0xff] }
 0x16a   : > { %v1401_v39 = vpop.f32.mrf.mxu0  ;;  %2950 = vmatmul.msk.f32.gmra.mxu1 %vm211_vm1, %v3473_v53 }
 0x16b   : > { %v3999_v46 = vadd.f32 %v1398_v20, %v1180_v25  ;;  %3016 = vmatmul.msk.f32.gmra.mxu2 %vm211_vm1, %v3476_v54 }
 0x16c   : > { %3082 = vmatmul.msk.f32.gmra.mxu3 %vm211_vm1, %v3408_v40  ;;  %v4450_v40 = vld [vmem:[#allocation16_spill] sm:$0xff] }
 0x16d   : > { %3148 = vmatmul.msk.f32.gmra.mxu0 %vm211_vm1, %v3501_v57 }
 0x16e   : > { %v844_v51 = vpop.f32.mrf.mxu2 }
 0x16f   : > { %v902_v52 = vadd.f32 %v844_v51, %v599_v36  ;;  %v1123_v17 = vpop.f32.mrf.mxu3  ;;  %v601_v41 = vpop.f32.mrf.mxu1 }
 0x170   : > { %v602_v54 = vadd.f32 %v601_v41, %v4450_v40 }
 0x171   : > { %v1181_v24 = vadd.f32 %v1123_v17, %v902_v52  ;;  %v3051_v17 = vld [vmem:[%s3252_s24 + $0x79] sm:$0xff] }
 0x172   : > { %v1404_v48 = vpop.f32.mrf.mxu0  ;;  %2951 = vmatmul.msk.f32.gmra.mxu1 %vm211_vm1, %v3487_v55  ;;  %v4451_v55 = vld [vmem:[#allocation2_spill] sm:$0xff] }
 0x173   : > { %v4011_v53 = vadd.f32 %v1401_v39, %v1181_v24  ;;  %3017 = vmatmul.msk.f32.gmra.mxu2 %vm211_vm1, %v3490_v56  ;;  %v4452_v56 = vld [vmem:[#allocation5_spill] sm:$0xff] }
 0x174   : > { %3083 = vmatmul.msk.f32.gmra.mxu3 %vm211_vm1, %v3049_v47  ;;  %v4455_v47 = vld [vmem:[#allocation8_spill] sm:$0xff] }
 0x175   : > { %3149 = vmatmul.msk.f32.gmra.mxu0 %vm211_vm1, %v3517_v60 }
 0x176   : > { %v847_v21 = vpop.f32.mrf.mxu2 }
 0x177   : > { %v903_v63 = vadd.f32 %v847_v21, %v602_v54  ;;  %v1126_v33 = vpop.f32.mrf.mxu3  ;;  %v604_v35 = vpop.f32.mrf.mxu1 }
 0x178   : > { %v605_v43 = vadd.f32 %v604_v35, %v4453_v5  ;;  %v4459_v5 = vld [vmem:[#allocation27_spill] sm:$0xff] }
 0x179   : > { %v1182_v20 = vadd.f32 %v1126_v33, %v903_v63 }
 0x17a   : > { %v1407_v49 = vpop.f32.mrf.mxu0  ;;  %2952 = vmatmul.msk.f32.gmra.mxu1 %vm211_vm1, %v3501_v57  ;;  %v4454_v57 = vld [vmem:[#allocation3_spill] sm:$0xff] }
 0x17b   : > { %v4022_v50 = vadd.f32 %v1404_v48, %v1182_v20  ;;  %3018 = vmatmul.msk.f32.gmra.mxu2 %vm211_vm1, %v4451_v55  ;;  %v4456_v48 = vld [vmem:[#allocation24_spill] sm:$0xff]  ;;  %v3052_v20 = vld [vmem:[%s3252_s24 + $0x81] sm:$0xff] }
 0x17c   : > { %3084 = vmatmul.msk.f32.gmra.mxu3 %vm211_vm1, %v3050_v31  ;;  %v4458_v55 = vld [vmem:[#allocation11_spill] sm:$0xff] }
 0x17d   : > { %3150 = vmatmul.msk.f32.gmra.mxu0 %vm211_vm1, %v4452_v56 }
 0x17e   : > { %v850_v25 = vpop.f32.mrf.mxu2 }
 0x17f   : > { %v904_v39 = vadd.f32 %v850_v25, %v605_v43  ;;  %v1129_v36 = vpop.f32.mrf.mxu3  ;;  %v607_v51 = vpop.f32.mrf.mxu1 }
 0x180   : > { %v608_v40 = vadd.f32 %v607_v51, %v4456_v48  ;;  %v4461_v48 = vld [vmem:[#allocation14_spill] sm:$0xff] }
 0x181   : > { %v1183_v52 = vadd.f32 %v1129_v36, %v904_v39 }
 0x182   : > { %v1410_v41 = vpop.f32.mrf.mxu0  ;;  %2953 = vmatmul.msk.f32.gmra.mxu1 %vm211_vm1, %v3517_v60  ;;  %v4457_v60 = vld [vmem:[#allocation6_spill] sm:$0xff] }
 0x183   : > { %v4033_v24 = vadd.f32 %v1407_v49, %v1183_v52  ;;  %3019 = vmatmul.msk.f32.gmra.mxu2 %vm211_vm1, %v4454_v57 }
 0x184   : > { %3085 = vmatmul.msk.f32.gmra.mxu3 %vm211_vm1, %v3051_v17  ;;  %v3053_v17 = vld [vmem:[%s3252_s24 + $0x91] sm:$0xff] }
 0x185   : > { %3151 = vmatmul.msk.f32.gmra.mxu0 %vm211_vm1, %v4455_v47 }
 0x186   : > { %v853_v54 = vpop.f32.mrf.mxu2 }
 0x187   : > { %v905_v21 = vadd.f32 %v853_v54, %v608_v40  ;;  %v1132_v63 = vpop.f32.mrf.mxu3  ;;  %v610_v33 = vpop.f32.mrf.mxu1  ;;  %v4462_v40 = vld [vmem:[#allocation4_spill] sm:$0xff] }
 0x188   : > { %v611_v43 = vadd.f32 %v610_v33, %v4459_v5 }
 0x189   : > { %v1184_v35 = vadd.f32 %v1132_v63, %v905_v21 }
 0x18a   : > { %v1413_v31 = vpop.f32.mrf.mxu0  ;;  %2954 = vmatmul.msk.f32.gmra.mxu1 %vm211_vm1, %v4452_v56  ;;  %v4460_v56 = vld [vmem:[#allocation9_spill] sm:$0xff] }
 0x18b   : > { %v4044_v49 = vadd.f32 %v1410_v41, %v1184_v35  ;;  %3020 = vmatmul.msk.f32.gmra.mxu2 %vm211_vm1, %v4457_v60 }
 0x18c   : > { %3086 = vmatmul.msk.f32.gmra.mxu3 %vm211_vm1, %v3052_v20 }
 0x18d   : > { %3152 = vmatmul.msk.f32.gmra.mxu0 %vm211_vm1, %v4458_v55 }
 0x18e   : > { %v856_v25 = vpop.f32.mrf.mxu2 }
 0x18f   : > { %v906_v39 = vadd.f32 %v856_v25, %v611_v43  ;;  %v1135_v36 = vpop.f32.mrf.mxu3  ;;  %v613_v51 = vpop.f32.mrf.mxu1  ;;  %v4464_v43 = vld [vmem:[#allocation18_spill] sm:$0xff]  ;;  %v4465_v25 = vld [vmem:[#allocation7_spill] sm:$0xff] }
 0x190   : > { %v614_v54 = vadd.f32 %v613_v51, %v4462_v40 }
 0x191   : > { %v1185_v52 = vadd.f32 %v1135_v36, %v906_v39 }
 0x192   : > { %v1416_v41 = vpop.f32.mrf.mxu0  ;;  %2955 = vmatmul.msk.f32.gmra.mxu1 %vm211_vm1, %v4455_v47  ;;  %v4463_v47 = vld [vmem:[#allocation12_spill] sm:$0xff] }
 0x193   : > { %v4055_v57 = vadd.f32 %v1413_v31, %v1185_v52  ;;  %3021 = vmatmul.msk.f32.gmra.mxu2 %vm211_vm1, %v4460_v56  ;;  %v3054_v31 = vld [vmem:[%s3252_s24 + $0x99] sm:$0xff]  ;;  %v3055_v56 = vld [vmem:[%s3252_s24 + $0xa9] sm:$0xff] }
 0x194   : > { %3087 = vmatmul.msk.f32.gmra.mxu3 %vm211_vm1, %v3053_v17 }
 0x195   : > { %3153 = vmatmul.msk.f32.gmra.mxu0 %vm211_vm1, %v4461_v48 }
 0x196   : > { %v859_v21 = vpop.f32.mrf.mxu2 }
 0x197   : > { %v907_v63 = vadd.f32 %v859_v21, %v614_v54  ;;  %v1138_v33 = vpop.f32.mrf.mxu3  ;;  %v616_v35 = vpop.f32.mrf.mxu1  ;;  %v4467_v21 = vld [vmem:[#allocation22_spill] sm:$0xff] }
 0x198   : > { %v617_v39 = vadd.f32 %v616_v35, %v4465_v25  ;;  %v3056_v25 = vld [vmem:[%s3252_s24 + $0xb1] sm:$0xff] }
 0x199   : > { %v1186_v20 = vadd.f32 %v1138_v33, %v907_v63  ;;  %v4468_v63 = vld [vmem:[#allocation10_spill] sm:$0xff] }
 0x19a   : > { %v1419_v60 = vpop.f32.mrf.mxu0  ;;  %2956 = vmatmul.msk.f32.gmra.mxu1 %vm211_vm1, %v4458_v55  ;;  %v4466_v55 = vld [vmem:[#allocation15_spill] sm:$0xff] }
 0x19b   : > { %v4066_v5 = vadd.f32 %v1416_v41, %v1186_v20  ;;  %3022 = vmatmul.msk.f32.gmra.mxu2 %vm211_vm1, %v4463_v47 }
 0x19c   : > { %3088 = vmatmul.msk.f32.gmra.mxu3 %vm211_vm1, %v3054_v31 }
 0x19d   : > { %3154 = vmatmul.msk.f32.gmra.mxu0 %vm211_vm1, %v4464_v43 }
 0x19e   : > { %v862_v36 = vpop.f32.mrf.mxu2 }
 0x19f   : > { %v908_v51 = vadd.f32 %v862_v36, %v617_v39  ;;  %v1141_v52 = vpop.f32.mrf.mxu3  ;;  %v619_v17 = vpop.f32.mrf.mxu1 }
 0x1a0   : > { %v620_v33 = vadd.f32 %v619_v17, %v4468_v63 }
 0x1a1   : > { %v1187_v41 = vadd.f32 %v1141_v52, %v908_v51  ;;  %v4470_v51 = vld [vmem:[#allocation26_spill] sm:$0xff]  ;;  %v4471_v52 = vld [vmem:[#allocation13_spill] sm:$0xff] }
 0x1a2   : > { %v1422_v40 = vpop.f32.mrf.mxu0  ;;  %2957 = vmatmul.msk.f32.gmra.mxu1 %vm211_vm1, %v4461_v48  ;;  %v4469_v48 = vld [vmem:[#allocation19_spill] sm:$0xff] }
 0x1a3   : > { %v4077_v54 = vadd.f32 %v1419_v60, %v1187_v41  ;;  %3023 = vmatmul.msk.f32.gmra.mxu2 %vm211_vm1, %v4466_v55 }
 0x1a4   : > { %3089 = vmatmul.msk.f32.gmra.mxu3 %vm211_vm1, %v3055_v56 }
 0x1a5   : > { %3155 = vmatmul.msk.f32.gmra.mxu0 %vm211_vm1, %v4467_v21 }
 0x1a6   : > { %v865_v35 = vpop.f32.mrf.mxu2 }
 0x1a7   : > { %v909_v20 = vadd.f32 %v865_v35, %v620_v33  ;;  %v1144_v31 = vpop.f32.mrf.mxu3  ;;  %v622_v47 = vpop.f32.mrf.mxu1  ;;  %v3057_v33 = vld [vmem:[%s3252_s24 + $0xc1] sm:$0xff] }
 0x1a8   : > { %v623_v17 = vadd.f32 %v622_v47, %v4471_v52  ;;  %v4474_v47 = vld [vmem:[#allocation17_spill] sm:$0xff] }
 0x1a9   : > { %v1188_v60 = vadd.f32 %v1144_v31, %v909_v20  ;;  %v4473_v31 = vld [vmem:[#allocation29_spill] sm:$0xff] }
 0x1aa   : > { %v1425_v39 = vpop.f32.mrf.mxu0  ;;  %2958 = vmatmul.msk.f32.gmra.mxu1 %vm211_vm1, %v4464_v43  ;;  %v4472_v43 = vld [vmem:[#allocation23_spill] sm:$0xff] }
 0x1ab   : > { %v4088_v36 = vadd.f32 %v1422_v40, %v1188_v60  ;;  %3024 = vmatmul.msk.f32.gmra.mxu2 %vm211_vm1, %v4469_v48 }
 0x1ac   : > { %3090 = vmatmul.msk.f32.gmra.mxu3 %vm211_vm1, %v3056_v25 }
 0x1ad   : > { %3156 = vmatmul.msk.f32.gmra.mxu0 %vm211_vm1, %v4470_v51 }
 0x1ae   : > { %v868_v41 = vpop.f32.mrf.mxu2 }
 0x1af   : > { %v910_v56 = vadd.f32 %v868_v41, %v623_v17  ;;  %v1147_v55 = vpop.f32.mrf.mxu3  ;;  %v625_v63 = vpop.f32.mrf.mxu1  ;;  %v3058_v41 = vld [vmem:[%s3252_s24 + $0xc9] sm:$0xff] }
 0x1b0   : > { %v626_v60 = vadd.f32 %v625_v63, %v4474_v47 }
 0x1b1   : > { %v1189_v40 = vadd.f32 %v1147_v55, %v910_v56 }
 0x1b2   : > { %v1428_v35 = vpop.f32.mrf.mxu0  ;;  %2959 = vmatmul.msk.f32.gmra.mxu1 %vm211_vm1, %v4467_v21  ;;  %v4475_v21 = vld [vmem:[#allocation21_spill] sm:$0xff] }
 0x1b3   : > { %v4099_v20 = vadd.f32 %v1425_v39, %v1189_v40  ;;  %3025 = vmatmul.msk.f32.gmra.mxu2 %vm211_vm1, %v4472_v43 }
 0x1b4   : > { %3091 = vmatmul.msk.f32.gmra.mxu3 %vm211_vm1, %v3057_v33 }
 0x1b5   : > { %3157 = vmatmul.msk.f32.gmra.mxu0 %vm211_vm1, %v4473_v31 }
 0x1b6   : > { %v871_v25 = vpop.f32.mrf.mxu2 }
 0x1b7   : > { %v911_v48 = vadd.f32 %v871_v25, %v626_v60  ;;  %v1150_v52 = vpop.f32.mrf.mxu3  ;;  %v628_v17 = vpop.f32.mrf.mxu1  ;;  %v3059_v60 = vld [vmem:[%s3252_s24 + $0xd9] sm:$0xff] }
 0x1b8   : > { %v629_v63 = vadd.f32 %v628_v17, %v4475_v21  ;;  %v3060_v21 = vld [vmem:[%s3252_s24 + $0xe1] sm:$0xff] }
 0x1b9   : > { %v1190_v39 = vadd.f32 %v1150_v52, %v911_v48 }
 0x1ba   : > { %v1431_v56 = vpop.f32.mrf.mxu0  ;;  %2960 = vmatmul.msk.f32.gmra.mxu1 %vm211_vm1, %v4470_v51 }
 0x1bb   : > { %v4110_v55 = vadd.f32 %v1428_v35, %v1190_v39  ;;  %3026 = vmatmul.msk.f32.gmra.mxu2 %vm211_vm1, %v3674_v44  ;;  %v4476_v44 = vld [vmem:[#allocation25_spill] sm:$0xff] }
 0x1bc   : > { %3092 = vmatmul.msk.f32.gmra.mxu3 %vm211_vm1, %v3058_v41 }
 0x1bd   : > { %3158 = vmatmul.msk.f32.gmra.mxu0 %vm211_vm1, %v3706_v2 }
 0x1be   : > { %v874_v40 = vpop.f32.mrf.mxu2 }
 0x1bf   : > { %v912_v33 = vadd.f32 %v874_v40, %v629_v63  ;;  %v1153_v43 = vpop.f32.mrf.mxu3  ;;  %v631_v47 = vpop.f32.mrf.mxu1 }
 0x1c0   : > { %v632_v51 = vadd.f32 %v631_v47, %v4476_v44 }
 0x1c1   : > { %v1191_v35 = vadd.f32 %v1153_v43, %v912_v33 }
 0x1c2   : > { %v1434_v25 = vpop.f32.mrf.mxu0  ;;  %2961 = vmatmul.msk.f32.gmra.mxu1 %vm211_vm1, %v4473_v31 }
 0x1c3   : > { %v4121_v48 = vadd.f32 %v1431_v56, %v1191_v35  ;;  %3027 = vmatmul.msk.f32.gmra.mxu2 %vm211_vm1, %v3694_v61  ;;  %v4477_v61 = vld [vmem:[#allocation28_spill] sm:$0xff] }
 0x1c4   : > { %3093 = vmatmul.msk.f32.gmra.mxu3 %vm211_vm1, %v3059_v60 }
 0x1c5   : > { %3159 = vmatmul.msk.f32.gmra.mxu0 %vm211_vm1, %v3723_v27 }
 0x1c6   : > { %v877_v52 = vpop.f32.mrf.mxu2 }
 0x1c7   : > { %v913_v17 = vadd.f32 %v877_v52, %v632_v51  ;;  %v1156_v39 = vpop.f32.mrf.mxu3  ;;  %v634_v41 = vpop.f32.mrf.mxu1 }
 0x1c8   : > { %v635_v31 = vadd.f32 %v634_v41, %v4477_v61 }
 0x1c9   : > { %v1192_v56 = vadd.f32 %v1156_v39, %v913_v17 }
 0x1ca   : > { %v1437_v63 = vpop.f32.mrf.mxu0  ;;  %2962 = vmatmul.msk.f32.gmra.mxu1 %vm211_vm1, %v3706_v2 }
 0x1cb   : > { %v4132_v40 = vadd.f32 %v1434_v25, %v1192_v56  ;;  %3028 = vmatmul.msk.f32.gmra.mxu2 %vm211_vm1, %v3709_v58  ;;  %v3061_v25 = vld [vmem:[%s3252_s24 + $0xf1] sm:$0xff]  ;;  %v4478_v58 = vld [vmem:[#allocation30_spill] sm:$0xff] }
 0x1cc   : > { %3094 = vmatmul.msk.f32.gmra.mxu3 %vm211_vm1, %v3060_v21  ;;  %v3062_v21 = vld [vmem:[%s3252_s24 + $0xf9] sm:$0xff] }
 0x1cd   : > { %3160 = vmatmul.msk.f32.gmra.mxu0 %vm211_vm1, %v3740_v62 }
 0x1ce   : > { %v880_v33 = vpop.f32.mrf.mxu2 }
 0x1cf   : > { %v914_v43 = vadd.f32 %v880_v33, %v635_v31  ;;  %v1159_v47 = vpop.f32.mrf.mxu3  ;;  %v1622_v35 = vpop.f32.mrf.mxu1 }
 0x1d0   : > { %v1718_v51 = vadd.f32 %v1622_v35, %v4478_v58 }
 0x1d1   : > { %v1193_v60 = vadd.f32 %v1159_v47, %v914_v43 }
 0x1d2   : > { %v2457_v44 = vpop.f32.mrf.mxu0  ;;  %2963 = vmatmul.msk.f32.gmra.mxu1 %vm211_vm1, %v3723_v27 }
 0x1d3   : > { %v4143_v2 = vadd.f32 %v1437_v63, %v1193_v60  ;;  %3029 = vmatmul.msk.f32.gmra.mxu2 %vm211_vm1, %v3726_v6  ;;  %v4479_v6 = vld [vmem:[#allocation31_spill] sm:$0xff] }
 0x1d4   : > { %3095 = vmatmul.msk.f32.gmra.mxu3 %vm211_vm1, %v3061_v25 }
 0x1d5   : > { %3161 = vmatmul.msk.f32.gmra.mxu0 %vm211_vm1, %v3757_v4 }
 0x1d6   : > { %v1901_v52 = vpop.f32.mrf.mxu2 }
 0x1d7   : > { %v1997_v17 = vadd.f32 %v1901_v52, %v1718_v51  ;;  %v2179_v39 = vpop.f32.mrf.mxu3  ;;  %v1625_v41 = vpop.f32.mrf.mxu1 }
 0x1d8   : > { %v1719_v61 = vadd.f32 %v1625_v41, %v4479_v6 }
 0x1d9   : > { %v2275_v56 = vadd.f32 %v2179_v39, %v1997_v17 }
 0x1da   : > { %v2460_v63 = vpop.f32.mrf.mxu0  ;;  %2964 = vmatmul.msk.f32.gmra.mxu1 %vm211_vm1, %v3740_v62  ;;  %v3063_v62 = vld [vmem:[%s3252_s24 + $0x109] sm:$0xff] }
 0x1db   : > { %v2553_v27 = vadd.f32 %v2457_v44, %v2275_v56  ;;  %3030 = vmatmul.msk.f32.gmra.mxu2 %vm211_vm1, %v3743_v13  ;;  %v4480_v13 = vld [vmem:[#allocation32_spill] sm:$0xff] }
 0x1dc   : > { %3096 = vmatmul.msk.f32.gmra.mxu3 %vm211_vm1, %v3062_v21 }
 0x1dd   : > { %3162 = vmatmul.msk.f32.gmra.mxu0 %vm211_vm1, %v3774_v16  ;;  %2585 = vst.msk [vmem:[%s4158_s8] sm:$0xff] %vm211_vm1, %v2553_v27 }
 0x1de   : > { %v1904_v31 = vpop.f32.mrf.mxu2 }
 0x1df   : > { %v1998_v33 = vadd.f32 %v1904_v31, %v1719_v61  ;;  %v2182_v43 = vpop.f32.mrf.mxu3  ;;  %v1628_v47 = vpop.f32.mrf.mxu1 }
 0x1e0   : > { %v1720_v44 = vadd.f32 %v1628_v47, %v4480_v13 }
 0x1e1   : > { %v2276_v35 = vadd.f32 %v2182_v43, %v1998_v33 }
 0x1e2   : > { %v2463_v60 = vpop.f32.mrf.mxu0  ;;  %2965 = vmatmul.msk.f32.gmra.mxu1 %vm211_vm1, %v3757_v4  ;;  %v3064_v4 = vld [vmem:[%s3252_s24 + $0x111] sm:$0xff] }
 0x1e3   : > { %v2554_v25 = vadd.f32 %v2460_v63, %v2276_v35  ;;  %3031 = vmatmul.msk.f32.gmra.mxu2 %vm211_vm1, %v3760_v14  ;;  %v4481_v14 = vld [vmem:[#allocation33_spill] sm:$0xff] }
 0x1e4   : > { %3097 = vmatmul.msk.f32.gmra.mxu3 %vm211_vm1, %v3063_v62 }
 0x1e5   : > { %3163 = vmatmul.msk.f32.gmra.mxu0 %vm211_vm1, %v3791_v32  ;;  %2586 = vst.msk [vmem:[%s4158_s8 + $0x8] sm:$0xff] %vm211_vm1, %v2554_v25 }
 0x1e6   : > { %v1907_v58 = vpop.f32.mrf.mxu2 }
 0x1e7   : > { %v1999_v51 = vadd.f32 %v1907_v58, %v1720_v44  ;;  %v2185_v52 = vpop.f32.mrf.mxu3  ;;  %v1631_v17 = vpop.f32.mrf.mxu1 }
 0x1e8   : > { %v1721_v21 = vadd.f32 %v1631_v17, %v4481_v14 }
 0x1e9   : > { %v2277_v39 = vadd.f32 %v2185_v52, %v1999_v51 }
 0x1ea   : > { %v2466_v41 = vpop.f32.mrf.mxu0  ;;  %2966 = vmatmul.msk.f32.gmra.mxu1 %vm211_vm1, %v3774_v16  ;;  %v3065_v16 = vld [vmem:[%s3252_s24 + $0x121] sm:$0xff] }
 0x1eb   : > { %v2555_v56 = vadd.f32 %v2463_v60, %v2277_v39  ;;  %3032 = vmatmul.msk.f32.gmra.mxu2 %vm211_vm1, %v3777_v18  ;;  %v4482_v18 = vld [vmem:[#allocation34_spill] sm:$0xff] }
 0x1ec   : > { %3098 = vmatmul.msk.f32.gmra.mxu3 %vm211_vm1, %v3064_v4 }
 0x1ed   : > { %3164 = vmatmul.msk.f32.gmra.mxu0 %vm211_vm1, %v3808_v45  ;;  %2587 = vst.msk [vmem:[%s4158_s8 + $0x10] sm:$0xff] %vm211_vm1, %v2555_v56 }
 0x1ee   : > { %v1910_v63 = vpop.f32.mrf.mxu2 }
 0x1ef   : > { %v2000_v27 = vadd.f32 %v1910_v63, %v1721_v21  ;;  %v2188_v6 = vpop.f32.mrf.mxu3  ;;  %v1634_v61 = vpop.f32.mrf.mxu1 }
 0x1f0   : > { %v1722_v47 = vadd.f32 %v1634_v61, %v4482_v18 }
 0x1f1   : > { %v2278_v31 = vadd.f32 %v2188_v6, %v2000_v27 }
 0x1f2   : > { %v2469_v33 = vpop.f32.mrf.mxu0  ;;  %2967 = vmatmul.msk.f32.gmra.mxu1 %vm211_vm1, %v3791_v32  ;;  %v3066_v32 = vld [vmem:[%s3252_s24 + $0x129] sm:$0xff] }
 0x1f3   : > { %v2556_v43 = vadd.f32 %v2466_v41, %v2278_v31  ;;  %3033 = vmatmul.msk.f32.gmra.mxu2 %vm211_vm1, %v3794_v22  ;;  %v4483_v22 = vld [vmem:[#allocation35_spill] sm:$0xff] }
 0x1f4   : > { %3099 = vmatmul.msk.f32.gmra.mxu3 %vm211_vm1, %v3065_v16 }
 0x1f5   : > { %3165 = vmatmul.msk.f32.gmra.mxu0 %vm211_vm1, %v3825_v0  ;;  %2588 = vst.msk [vmem:[%s4158_s8 + $0x18] sm:$0xff] %vm211_vm1, %v2556_v43 }
 0x1f6   : > { %v1913_v35 = vpop.f32.mrf.mxu2 }
 0x1f7   : > { %v2001_v62 = vadd.f32 %v1913_v35, %v1722_v47  ;;  %v2191_v60 = vpop.f32.mrf.mxu3  ;;  %v1637_v25 = vpop.f32.mrf.mxu1 }
 0x1f8   : > { %v1723_v51 = vadd.f32 %v1637_v25, %v4483_v22 }
 0x1f9   : > { %v2279_v13 = vadd.f32 %v2191_v60, %v2001_v62 }
 0x1fa   : > { %v2472_v44 = vpop.f32.mrf.mxu0  ;;  %2968 = vmatmul.msk.f32.gmra.mxu1 %vm211_vm1, %v3808_v45  ;;  %v3067_v45 = vld [vmem:[%s3252_s24 + $0x139] sm:$0xff] }
 0x1fb   : > { %v2557_v58 = vadd.f32 %v2469_v33, %v2279_v13  ;;  %3034 = vmatmul.msk.f32.gmra.mxu2 %vm211_vm1, %v3811_v29  ;;  %v4484_v29 = vld [vmem:[#allocation36_spill] sm:$0xff] }
 0x1fc   : > { %3100 = vmatmul.msk.f32.gmra.mxu3 %vm211_vm1, %v3066_v32 }
 0x1fd   : > { %3166 = vmatmul.msk.f32.gmra.mxu0 %vm211_vm1, %v3842_v26  ;;  %2589 = vst.msk [vmem:[%s4158_s8 + $0x20] sm:$0xff] %vm211_vm1, %v2557_v58 }
 0x1fe   : > { %v1916_v52 = vpop.f32.mrf.mxu2 }
 0x1ff   : > { %v2002_v17 = vadd.f32 %v1916_v52, %v1723_v51  ;;  %v2194_v39 = vpop.f32.mrf.mxu3  ;;  %v1640_v4 = vpop.f32.mrf.mxu1 }
 0x200   : > { %v1724_v21 = vadd.f32 %v1640_v4, %v4484_v29  ;;  %v4488_v4 = vld [vmem:[#allocation39_spill] sm:$0xff] }
 0x201   : > { %v2280_v41 = vadd.f32 %v2194_v39, %v2002_v17 }
 0x202   : > { %v2475_v56 = vpop.f32.mrf.mxu0  ;;  %2969 = vmatmul.msk.f32.gmra.mxu1 %vm211_vm1, %v3825_v0  ;;  %v3068_v0 = vld [vmem:[%s3252_s24 + $0x141] sm:$0xff] }
 0x203   : > { %v2558_v14 = vadd.f32 %v2472_v44, %v2280_v41  ;;  %3035 = vmatmul.msk.f32.gmra.mxu2 %vm211_vm1, %v3828_v34  ;;  %v4485_v34 = vld [vmem:[#allocation37_spill] sm:$0xff] }
 0x204   : > { %3101 = vmatmul.msk.f32.gmra.mxu3 %vm211_vm1, %v3067_v45 }
 0x205   : > { %3167 = vmatmul.msk.f32.gmra.mxu0 %vm211_vm1, %v3859_v12  ;;  %2590 = vst.msk [vmem:[%s4158_s8 + $0x28] sm:$0xff] %vm211_vm1, %v2558_v14 }
 0x206   : > { %v1919_v63 = vpop.f32.mrf.mxu2 }
 0x207   : > { %v2003_v27 = vadd.f32 %v1919_v63, %v1724_v21  ;;  %v2197_v6 = vpop.f32.mrf.mxu3  ;;  %v1643_v61 = vpop.f32.mrf.mxu1 }
 0x208   : > { %v1725_v43 = vadd.f32 %v1643_v61, %v4485_v34 }
 0x209   : > { %v2281_v31 = vadd.f32 %v2197_v6, %v2003_v27  ;;  %v4490_v6 = vld [vmem:[#allocation40_spill] sm:$0xff] }
 0x20a   : > { %v2478_v16 = vpop.f32.mrf.mxu0  ;;  %2970 = vmatmul.msk.f32.gmra.mxu1 %vm211_vm1, %v3842_v26  ;;  %v3069_v26 = vld [vmem:[%s3252_s24 + $0x151] sm:$0xff] }
 0x20b   : > { %v2559_v33 = vadd.f32 %v2475_v56, %v2281_v31  ;;  %3036 = vmatmul.msk.f32.gmra.mxu2 %vm211_vm1, %v3845_v38  ;;  %v4486_v38 = vld [vmem:[#allocation38_spill] sm:$0xff] }
 0x20c   : > { %3102 = vmatmul.msk.f32.gmra.mxu3 %vm211_vm1, %v3068_v0 }
 0x20d   : > { %3168 = vmatmul.msk.f32.gmra.mxu0 %vm211_vm1, %v3876_v59  ;;  %2591 = vst.msk [vmem:[%s4158_s8 + $0x30] sm:$0xff] %vm211_vm1, %v2559_v33 }
 0x20e   : > { %v1922_v18 = vpop.f32.mrf.mxu2 }
 0x20f   : > { %v2004_v47 = vadd.f32 %v1922_v18, %v1725_v43  ;;  %v2200_v35 = vpop.f32.mrf.mxu3  ;;  %v1646_v62 = vpop.f32.mrf.mxu1 }
 0x210   : > { %v1726_v32 = vadd.f32 %v1646_v62, %v4486_v38  ;;  %v3139_v38 = vld [vmem:[%s3252_s24 + $0x182] sm:$0xff] }
 0x211   : > { %v2282_v60 = vadd.f32 %v2200_v35, %v2004_v47 }
 0x212   : > { %v2481_v25 = vpop.f32.mrf.mxu0  ;;  %2971 = vmatmul.msk.f32.gmra.mxu1 %vm211_vm1, %v3859_v12  ;;  %v3070_v12 = vld [vmem:[%s3252_s24 + $0x159] sm:$0xff] }
 0x213   : > { %v2560_v13 = vadd.f32 %v2478_v16, %v2282_v60  ;;  %3037 = vmatmul.msk.f32.gmra.mxu2 %vm211_vm1, %v3862_v7  ;;  %v4487_v7 = vld [vmem:[#allocation42_spill] sm:$0xff] }
 0x214   : > { %3103 = vmatmul.msk.f32.gmra.mxu3 %vm211_vm1, %v3069_v26 }
 0x215   : > { %3169 = vmatmul.msk.f32.gmra.mxu0 %vm211_vm1, %v3893_v1  ;;  %2592 = vst.msk [vmem:[%s4158_s8 + $0x38] sm:$0xff] %vm211_vm1, %v2560_v13 }
 0x216   : > { %v1925_v44 = vpop.f32.mrf.mxu2 }
 0x217   : > { %v2005_v58 = vadd.f32 %v1925_v44, %v1726_v32  ;;  %v2203_v22 = vpop.f32.mrf.mxu3  ;;  %v1649_v51 = vpop.f32.mrf.mxu1 }
 0x218   : > { %v1727_v41 = vadd.f32 %v1649_v51, %v4488_v4 }
 0x219   : > { %v2283_v52 = vadd.f32 %v2203_v22, %v2005_v58 }
 0x21a   : > { %v2484_v17 = vpop.f32.mrf.mxu0  ;;  %2972 = vmatmul.msk.f32.gmra.mxu1 %vm211_vm1, %v3876_v59  ;;  %v3071_v59 = vld [vmem:[%s3252_s24 + $0x169] sm:$0xff] }
 0x21b   : > { %v2561_v39 = vadd.f32 %v2481_v25, %v2283_v52  ;;  %3038 = vmatmul.msk.f32.gmra.mxu2 %vm211_vm1, %v3879_v11  ;;  %v4489_v11 = vld [vmem:[#allocation44_spill] sm:$0xff] }
 0x21c   : > { %3104 = vmatmul.msk.f32.gmra.mxu3 %vm211_vm1, %v3070_v12 }
 0x21d   : > { %3170 = vmatmul.msk.f32.gmra.mxu0 %vm211_vm1, %v4487_v7  ;;  %2593 = vst.msk [vmem:[%s4158_s8 + $0x40] sm:$0xff] %vm211_vm1, %v2561_v39  ;;  %v3140_v39 = vld [vmem:[%s3252_s24 + $0x18a] sm:$0xff] }
 0x21e   : > { %v1928_v45 = vpop.f32.mrf.mxu2 }
 0x21f   : > { %v2006_v56 = vadd.f32 %v1928_v45, %v1727_v41  ;;  %v2206_v14 = vpop.f32.mrf.mxu3  ;;  %v1652_v29 = vpop.f32.mrf.mxu1 }
 0x220   : > { %v1728_v61 = vadd.f32 %v1652_v29, %v4490_v6  ;;  %v3075_v29 = vld [vmem:[%s3252_s24 + $0x199] sm:$0xff] }
 0x221   : > { %v2284_v21 = vadd.f32 %v2206_v14, %v2006_v56  ;;  %v3009_v14 = vld [vmem:[%s3252_s24 + $0x198] sm:$0xff] }
 0x222   : > { %v2487_v63 = vpop.f32.mrf.mxu0  ;;  %2973 = vmatmul.msk.f32.gmra.mxu1 %vm211_vm1, %v3893_v1  ;;  %v3072_v1 = vld [vmem:[%s3252_s24 + $0x171] sm:$0xff] }
 0x223   : > { %v2562_v27 = vadd.f32 %v2484_v17, %v2284_v21  ;;  %3039 = vmatmul.msk.f32.gmra.mxu2 %vm211_vm1, %v3896_v15  ;;  %v4491_v15 = vld [vmem:[#allocation41_spill] sm:$0xff] }
 0x224   : > { %3105 = vmatmul.msk.f32.gmra.mxu3 %vm211_vm1, %v3071_v59  ;;  %v3141_v21 = vld [vmem:[%s3252_s24 + $0x19a] sm:$0xff] }
 0x225   : > { %3171 = vmatmul.msk.f32.gmra.mxu0 %vm211_vm1, %v4489_v11  ;;  %2594 = vst.msk [vmem:[%s4158_s8 + $0x48] sm:$0xff] %vm211_vm1, %v2562_v27 }
 0x226   : > { %v1931_v31 = vpop.f32.mrf.mxu2 }
 0x227   : > { %v2007_v0 = vadd.f32 %v1931_v31, %v1728_v61  ;;  %v2209_v16 = vpop.f32.mrf.mxu3  ;;  %v1655_v33 = vpop.f32.mrf.mxu1  ;;  %v3010_v61 = vld [vmem:[%s3252_s24 + $0x1a0] sm:$0xff] }
 0x228   : > { %v1729_v47 = vadd.f32 %v1655_v33, %v4491_v15  ;;  %v3142_v33 = vld [vmem:[%s3252_s24 + $0x1a2] sm:$0xff] }
 0x229   : > { %v2285_v34 = vadd.f32 %v2209_v16, %v2007_v0  ;;  %v3076_v0 = vld [vmem:[%s3252_s24 + $0x1a1] sm:$0xff] }
 0x22a   : > { %v2490_v43 = vpop.f32.mrf.mxu0  ;;  %2974 = vmatmul.msk.f32.gmra.mxu1 %vm211_vm1, %v4487_v7 }
 0x22b   : > { %v2563_v18 = vadd.f32 %v2487_v63, %v2285_v34  ;;  %3040 = vmatmul.msk.f32.gmra.mxu2 %vm211_vm1, %v3913_v19  ;;  %v4492_v19 = vld [vmem:[#allocation43_spill] sm:$0xff] }
 0x22c   : > { %3106 = vmatmul.msk.f32.gmra.mxu3 %vm211_vm1, %v3072_v1 }
 0x22d   : > { %3172 = vmatmul.msk.f32.gmra.mxu0 %vm211_vm1, %v3947_v37  ;;  %2595 = vst.msk [vmem:[%s4158_s8 + $0x50] sm:$0xff] %vm211_vm1, %v2563_v18 }
 0x22e   : > { %v1934_v35 = vpop.f32.mrf.mxu2 }
 0x22f   : > { %v2008_v62 = vadd.f32 %v1934_v35, %v1729_v47  ;;  %v2212_v60 = vpop.f32.mrf.mxu3  ;;  %v1658_v26 = vpop.f32.mrf.mxu1 }
 0x230   : > { %v1730_v44 = vadd.f32 %v1658_v26, %v4492_v19 }
 0x231   : > { %v2286_v25 = vadd.f32 %v2212_v60, %v2008_v62 }
 0x232   : > { %v2493_v13 = vpop.f32.mrf.mxu0  ;;  %2975 = vmatmul.msk.f32.gmra.mxu1 %vm211_vm1, %v4489_v11 }
 0x233   : > { %v2564_v32 = vadd.f32 %v2490_v43, %v2286_v25  ;;  %3041 = vmatmul.msk.f32.gmra.mxu2 %vm211_vm1, %v3930_v23 }
 0x234   : > { %3107 = vmatmul.msk.f32.gmra.mxu3 %vm211_vm1, %v3933_v28  ;;  %v4493_v28 = vld [vmem:[#allocation45_spill] sm:$0xff] }
 0x235   : > { %3173 = vmatmul.msk.f32.gmra.mxu0 %vm211_vm1, %v3139_v38  ;;  %2596 = vst.msk [vmem:[%s4158_s8 + $0x58] sm:$0xff] %vm211_vm1, %v2564_v32 }
 0x236   : > { %v1937_v58 = vpop.f32.mrf.mxu2 }
 0x237   : > { %v2009_v22 = vadd.f32 %v1937_v58, %v1730_v44  ;;  %v2215_v51 = vpop.f32.mrf.mxu3  ;;  %v1661_v52 = vpop.f32.mrf.mxu1 }
 0x238   : > { %v1731_v7 = vadd.f32 %v1661_v52, %v4493_v28 }
 0x239   : > { %v2287_v12 = vadd.f32 %v2215_v51, %v2009_v22 }
 0x23a   : > { %v2496_v17 = vpop.f32.mrf.mxu0  ;;  %2976 = vmatmul.msk.f32.gmra.mxu1 %vm211_vm1, %v3947_v37 }
 0x23b   : > { %v2565_v23 = vadd.f32 %v2493_v13, %v2287_v12  ;;  %3042 = vmatmul.msk.f32.gmra.mxu2 %vm211_vm1, %v3950_v30 }
 0x23c   : > { %3108 = vmatmul.msk.f32.gmra.mxu3 %vm211_vm1, %v3953_v9 }
 0x23d   : > { %3174 = vmatmul.msk.f32.gmra.mxu0 %vm211_vm1, %v3140_v39  ;;  %2597 = vst.msk [vmem:[%s4158_s8 + $0x60] sm:$0xff] %vm211_vm1, %v2565_v23 }
 0x23e   : > { %v1940_v4 = vpop.f32.mrf.mxu2 }
 0x23f   : > { %v2010_v41 = vadd.f32 %v1940_v4, %v1731_v7  ;;  %v2218_v45 = vpop.f32.mrf.mxu3  ;;  %v1664_v56 = vpop.f32.mrf.mxu1 }
 0x240   : > { %v1732_v59 = vadd.f32 %v1664_v56, %v3955_v8 }
 0x241   : > { %v2288_v37 = vadd.f32 %v2218_v45, %v2010_v41 }
 0x242   : > { %v2499_v30 = vpop.f32.mrf.mxu0  ;;  %2977 = vmatmul.msk.f32.gmra.mxu1 %vm211_vm1, %v3139_v38 }
 0x243   : > { %v2566_v9 = vadd.f32 %v2496_v17, %v2288_v37  ;;  %3043 = vmatmul.msk.f32.gmra.mxu2 %vm211_vm1, %v3009_v14 }
 0x244   : > { %3109 = vmatmul.msk.f32.gmra.mxu3 %vm211_vm1, %v3075_v29 }
 0x245   : > { %3175 = vmatmul.msk.f32.gmra.mxu0 %vm211_vm1, %v3141_v21  ;;  %2598 = vst.msk [vmem:[%s4158_s8 + $0x68] sm:$0xff] %vm211_vm1, %v2566_v9 }
 0x246   : > { %v1943_v63 = vpop.f32.mrf.mxu2 }
 0x247   : > { %v2011_v27 = vadd.f32 %v1943_v63, %v1732_v59  ;;  %v2221_v11 = vpop.f32.mrf.mxu3  ;;  %v1667_v6 = vpop.f32.mrf.mxu1 }
 0x248   : > { %v1733_v8 = vadd.f32 %v1667_v6, %v3966_v3 }
 0x249   : > { %v2289_v31 = vadd.f32 %v2221_v11, %v2011_v27 }
 0x24a   : > { %v2502_v16 = vpop.f32.mrf.mxu0  ;;  %2978 = vmatmul.msk.f32.gmra.mxu1 %vm211_vm1, %v3140_v39 }
 0x24b   : > { %v2567_v34 = vadd.f32 %v2499_v30, %v2289_v31  ;;  %3044 = vmatmul.msk.f32.gmra.mxu2 %vm211_vm1, %v3010_v61 }
 0x24c   : > { %3110 = vmatmul.msk.f32.gmra.mxu3 %vm211_vm1, %v3076_v0 }
 0x24d   : > { %3176 = vmatmul.msk.f32.gmra.mxu0 %vm211_vm1, %v3142_v33  ;;  %2599 = vst.msk [vmem:[%s4158_s8 + $0x70] sm:$0xff] %vm211_vm1, %v2567_v34 }
 0x24e   : > { %v1946_v1 = vpop.f32.mrf.mxu2 }
 0x24f   : > { %v2012_v43 = vadd.f32 %v1946_v1, %v1733_v8  ;;  %v2224_v18 = vpop.f32.mrf.mxu3  ;;  %v1670_v15 = vpop.f32.mrf.mxu1 }
 0x250   : > { %v1734_v60 = vadd.f32 %v1670_v15, %v3977_v10 }
 0x251   : > { %v2290_v47 = vadd.f32 %v2224_v18, %v2012_v43 }
 0x252   : > { %v2505_v35 = vpop.f32.mrf.mxu0 }
 0x253   : > { %v2568_v62 = vadd.f32 %v2502_v16, %v2290_v47 }
 0x255   : > { %2600 = vst.msk [vmem:[%s4158_s8 + $0x78] sm:$0xff] %vm211_vm1, %v2568_v62 }
 0x256   : > { %v1949_v26 = vpop.f32.mrf.mxu2 }
 0x257   : > { %v2013_v25 = vadd.f32 %v1949_v26, %v1734_v60  ;;  %v2227_v13 = vpop.f32.mrf.mxu3  ;;  %v1673_v38 = vpop.f32.mrf.mxu1 }
 0x258   : > { %v1735_v44 = vadd.f32 %v1673_v38, %v3988_v42 }
 0x259   : > { %v2291_v3 = vadd.f32 %v2227_v13, %v2013_v25 }
 0x25a   : > { %v2508_v32 = vpop.f32.mrf.mxu0 }
 0x25b   : > { %v2569_v19 = vadd.f32 %v2505_v35, %v2291_v3 }
 0x25d   : > { %2601 = vst.msk [vmem:[%s4158_s8 + $0x80] sm:$0xff] %vm211_vm1, %v2569_v19 }
 0x25e   : > { %v1952_v58 = vpop.f32.mrf.mxu2 }
 0x25f   : > { %v2014_v22 = vadd.f32 %v1952_v58, %v1735_v44  ;;  %v2230_v51 = vpop.f32.mrf.mxu3  ;;  %v1676_v52 = vpop.f32.mrf.mxu1 }
 0x260   : > { %v1736_v39 = vadd.f32 %v1676_v52, %v3999_v46 }
 0x261   : > { %v2292_v10 = vadd.f32 %v2230_v51, %v2014_v22 }
 0x262   : > { %v2511_v12 = vpop.f32.mrf.mxu0 }
 0x263   : > { %v2570_v17 = vadd.f32 %v2508_v32, %v2292_v10 }
 0x265   : > { %2602 = vst.msk [vmem:[%s4158_s8 + $0x88] sm:$0xff] %vm211_vm1, %v2570_v17 }
 0x266   : > { %v1955_v23 = vpop.f32.mrf.mxu2 }
 0x267   : > { %v2015_v28 = vadd.f32 %v1955_v23, %v1736_v39  ;;  %v2233_v7 = vpop.f32.mrf.mxu3  ;;  %v1679_v4 = vpop.f32.mrf.mxu1 }
 0x268   : > { %v1737_v56 = vadd.f32 %v1679_v4, %v4011_v53 }
 0x269   : > { %v2293_v42 = vadd.f32 %v2233_v7, %v2015_v28 }
 0x26a   : > { %v2514_v41 = vpop.f32.mrf.mxu0 }
 0x26b   : > { %v2571_v45 = vadd.f32 %v2511_v12, %v2293_v42 }
 0x26d   : > { %2603 = vst.msk [vmem:[%s4158_s8 + $0x90] sm:$0xff] %vm211_vm1, %v2571_v45 }
 0x26e   : > { %v1958_v14 = vpop.f32.mrf.mxu2 }
 0x26f   : > { %v2016_v37 = vadd.f32 %v1958_v14, %v1737_v56  ;;  %v2236_v29 = vpop.f32.mrf.mxu3  ;;  %v1682_v30 = vpop.f32.mrf.mxu1 }
 0x270   : > { %v1738_v59 = vadd.f32 %v1682_v30, %v4022_v50 }
 0x271   : > { %v2294_v46 = vadd.f32 %v2236_v29, %v2016_v37 }
 0x272   : > { %v2517_v21 = vpop.f32.mrf.mxu0 }
 0x273   : > { %v2572_v9 = vadd.f32 %v2514_v41, %v2294_v46 }
 0x275   : > { %2604 = vst.msk [vmem:[%s4158_s8 + $0x98] sm:$0xff] %vm211_vm1, %v2572_v9 }
 0x276   : > { %v1961_v63 = vpop.f32.mrf.mxu2 }
 0x277   : > { %v2017_v27 = vadd.f32 %v1961_v63, %v1738_v59  ;;  %v2239_v11 = vpop.f32.mrf.mxu3  ;;  %v1685_v6 = vpop.f32.mrf.mxu1 }
 0x278   : > { %v1739_v0 = vadd.f32 %v1685_v6, %v4033_v24 }
 0x279   : > { %v2295_v53 = vadd.f32 %v2239_v11, %v2017_v27 }
 0x27a   : > { %v2520_v61 = vpop.f32.mrf.mxu0 }
 0x27b   : > { %v2573_v31 = vadd.f32 %v2517_v21, %v2295_v53 }
 0x27d   : > { %2605 = vst.msk [vmem:[%s4158_s8 + $0xa0] sm:$0xff] %vm211_vm1, %v2573_v31 }
 0x27e   : > { %v1964_v16 = vpop.f32.mrf.mxu2 }
 0x27f   : > { %v2018_v33 = vadd.f32 %v1964_v16, %v1739_v0  ;;  %v2242_v34 = vpop.f32.mrf.mxu3  ;;  %v1688_v8 = vpop.f32.mrf.mxu1 }
 0x280   : > { %v1740_v18 = vadd.f32 %v1688_v8, %v4044_v49 }
 0x281   : > { %v2296_v50 = vadd.f32 %v2242_v34, %v2018_v33 }
 0x282   : > { %v2523_v1 = vpop.f32.mrf.mxu0 }
 0x283   : > { %v2574_v43 = vadd.f32 %v2520_v61, %v2296_v50 }
 0x285   : > { %2606 = vst.msk [vmem:[%s4158_s8 + $0xa8] sm:$0xff] %vm211_vm1, %v2574_v43 }
 0x286   : > { %v1967_v15 = vpop.f32.mrf.mxu2 }
 0x287   : > { %v2019_v47 = vadd.f32 %v1967_v15, %v1740_v18  ;;  %v2245_v35 = vpop.f32.mrf.mxu3  ;;  %v1691_v62 = vpop.f32.mrf.mxu1 }
 0x288   : > { %v1741_v25 = vadd.f32 %v1691_v62, %v4055_v57 }
 0x289   : > { %v2297_v24 = vadd.f32 %v2245_v35, %v2019_v47 }
 0x28a   : > { %v2526_v60 = vpop.f32.mrf.mxu0 }
 0x28b   : > { %v2575_v26 = vadd.f32 %v2523_v1, %v2297_v24 }
 0x28d   : > { %2607 = vst.msk [vmem:[%s4158_s8 + $0xb0] sm:$0xff] %vm211_vm1, %v2575_v26 }
 0x28e   : > { %v1970_v13 = vpop.f32.mrf.mxu2 }
 0x28f   : > { %v2020_v38 = vadd.f32 %v1970_v13, %v1741_v25  ;;  %v2248_v3 = vpop.f32.mrf.mxu3  ;;  %v1694_v32 = vpop.f32.mrf.mxu1 }
 0x290   : > { %v1742_v58 = vadd.f32 %v1694_v32, %v4066_v5 }
 0x291   : > { %v2298_v49 = vadd.f32 %v2248_v3, %v2020_v38 }
 0x292   : > { %v2529_v19 = vpop.f32.mrf.mxu0 }
 0x293   : > { %v2576_v44 = vadd.f32 %v2526_v60, %v2298_v49 }
 0x295   : > { %2608 = vst.msk [vmem:[%s4158_s8 + $0xb8] sm:$0xff] %vm211_vm1, %v2576_v44 }
 0x296   : > { %v1973_v22 = vpop.f32.mrf.mxu2 }
 0x297   : > { %v2021_v51 = vadd.f32 %v1973_v22, %v1742_v58  ;;  %v2251_v52 = vpop.f32.mrf.mxu3  ;;  %v1697_v10 = vpop.f32.mrf.mxu1 }
 0x298   : > { %v1743_v39 = vadd.f32 %v1697_v10, %v4077_v54 }
 0x299   : > { %v2299_v57 = vadd.f32 %v2251_v52, %v2021_v51 }
 0x29a   : > { %v2532_v12 = vpop.f32.mrf.mxu0 }
 0x29b   : > { %v2577_v17 = vadd.f32 %v2529_v19, %v2299_v57 }
 0x29d   : > { %2609 = vst.msk [vmem:[%s4158_s8 + $0xc0] sm:$0xff] %vm211_vm1, %v2577_v17 }
 0x29e   : > { %v1976_v23 = vpop.f32.mrf.mxu2 }
 0x29f   : > { %v2022_v28 = vadd.f32 %v1976_v23, %v1743_v39  ;;  %v2254_v7 = vpop.f32.mrf.mxu3  ;;  %v1700_v4 = vpop.f32.mrf.mxu1 }
 0x2a0   : > { %v1744_v45 = vadd.f32 %v1700_v4, %v4088_v36 }
 0x2a1   : > { %v2300_v5 = vadd.f32 %v2254_v7, %v2022_v28 }
 0x2a2   : > { %v2535_v42 = vpop.f32.mrf.mxu0 }
 0x2a3   : > { %v2578_v41 = vadd.f32 %v2532_v12, %v2300_v5 }
 0x2a5   : > { %2610 = vst.msk [vmem:[%s4158_s8 + $0xc8] sm:$0xff] %vm211_vm1, %v2578_v41 }
 0x2a6   : > { %v1979_v56 = vpop.f32.mrf.mxu2 }
 0x2a7   : > { %v2023_v14 = vadd.f32 %v1979_v56, %v1744_v45  ;;  %v2257_v37 = vpop.f32.mrf.mxu3  ;;  %v1703_v29 = vpop.f32.mrf.mxu1 }
 0x2a8   : > { %v1745_v21 = vadd.f32 %v1703_v29, %v4099_v20 }
 0x2a9   : > { %v2301_v54 = vadd.f32 %v2257_v37, %v2023_v14 }
 0x2aa   : > { %v2538_v30 = vpop.f32.mrf.mxu0 }
 0x2ab   : > { %v2579_v46 = vadd.f32 %v2535_v42, %v2301_v54 }
 0x2ad   : > { %2611 = vst.msk [vmem:[%s4158_s8 + $0xd0] sm:$0xff] %vm211_vm1, %v2579_v46 }
 0x2ae   : > { %v1982_v9 = vpop.f32.mrf.mxu2 }
 0x2af   : > { %v2024_v59 = vadd.f32 %v1982_v9, %v1745_v21  ;;  %v2260_v63 = vpop.f32.mrf.mxu3  ;;  %v1706_v27 = vpop.f32.mrf.mxu1 }
 0x2b0   : > { %v1746_v53 = vadd.f32 %v1706_v27, %v4110_v55 }
 0x2b1   : > { %v2302_v36 = vadd.f32 %v2260_v63, %v2024_v59 }
 0x2b2   : > { %v2541_v11 = vpop.f32.mrf.mxu0 }
 0x2b3   : > { %v2580_v6 = vadd.f32 %v2538_v30, %v2302_v36 }
 0x2b5   : > { %2612 = vst.msk [vmem:[%s4158_s8 + $0xd8] sm:$0xff] %vm211_vm1, %v2580_v6 }
 0x2b6   : > { %v1985_v61 = vpop.f32.mrf.mxu2 }
 0x2b7   : > { %v2025_v31 = vadd.f32 %v1985_v61, %v1746_v53  ;;  %v2263_v0 = vpop.f32.mrf.mxu3  ;;  %v1709_v16 = vpop.f32.mrf.mxu1 }
 0x2b8   : > { %v1747_v8 = vadd.f32 %v1709_v16, %v4121_v48 }
 0x2b9   : > { %v2303_v20 = vadd.f32 %v2263_v0, %v2025_v31 }
 0x2ba   : > { %v2544_v34 = vpop.f32.mrf.mxu0 }
 0x2bb   : > { %v2581_v33 = vadd.f32 %v2541_v11, %v2303_v20 }
 0x2bd   : > { %2613 = vst.msk [vmem:[%s4158_s8 + $0xe0] sm:$0xff] %vm211_vm1, %v2581_v33 }
 0x2be   : > { %v1988_v50 = vpop.f32.mrf.mxu2 }
 0x2bf   : > { %v2026_v1 = vadd.f32 %v1988_v50, %v1747_v8  ;;  %v2266_v43 = vpop.f32.mrf.mxu3  ;;  %v1712_v18 = vpop.f32.mrf.mxu1 }
 0x2c0   : > { %v1748_v47 = vadd.f32 %v1712_v18, %v4132_v40 }
 0x2c1   : > { %v2304_v55 = vadd.f32 %v2266_v43, %v2026_v1 }
 0x2c2   : > { %v2547_v62 = vpop.f32.mrf.mxu0 }
 0x2c3   : > { %v2582_v15 = vadd.f32 %v2544_v34, %v2304_v55 }
 0x2c5   : > { %2614 = vst.msk [vmem:[%s4158_s8 + $0xe8] sm:$0xff] %vm211_vm1, %v2582_v15 }
 0x2c6   : > { %v1991_v35 = vpop.f32.mrf.mxu2 }
 0x2c7   : > { %v2027_v24 = vadd.f32 %v1991_v35, %v1748_v47  ;;  %v2269_v60 = vpop.f32.mrf.mxu3  ;;  %v1715_v48 = vpop.f32.mrf.mxu1 }
 0x2c8   : > { %v1749_v13 = vadd.f32 %v1715_v48, %v4143_v2 }
 0x2c9   : > { %v2305_v26 = vadd.f32 %v2269_v60, %v2027_v24 }
 0x2ca   : > { %v2550_v49 = vpop.f32.mrf.mxu0 }
 0x2cb   : > { %v2583_v25 = vadd.f32 %v2547_v62, %v2305_v26 }
 0x2cd   : > { %2615 = vst.msk [vmem:[%s4158_s8 + $0xf0] sm:$0xff] %vm211_vm1, %v2583_v25 }
 0x2ce   : > { %v1994_v38 = vpop.f32.mrf.mxu2 }
 0x2cf   : > { %v2028_v3 = vadd.f32 %v1994_v38, %v1749_v13  ;;  %v2272_v32 = vpop.f32.mrf.mxu3 }
 0x2d1   : > { %v2306_v19 = vadd.f32 %v2272_v32, %v2028_v3 }
 0x2d3   : > { %v2584_v40 = vadd.f32 %v2550_v49, %v2306_v19 }
 0x2d5   : > { %2616 = vst.msk [vmem:[%s4158_s8 + $0xf8] sm:$0xff] %vm211_vm1, %v2584_v40 }
 0x2d6 PF: > { %s12_s9 = sadd.s32 1, %s3198_s9  }
 0x2d7   : > { %p9_p4 = scmp.ge.s32.totalorder %s12_s9, 4  }
 0x2d9   :  { %11 = sbr.rel (!%p9_p4) target bundleno = 1 (0x1), region = 68 }

</bundles_post_ra>
